<compile_context>
chip_gen: v7x
topology: tpu7x:2x2x1
jax: 0.10.0
libtpu: 0.0.40
codegen_flags: <defaults>
</compile_context>

<pallas_src>
import numpy as np
import jax
import jax.numpy as jnp
from jax.experimental import pallas as pl
from jax.experimental.pallas import tpu as pltpu


def _vmem_spec():
    # Whole-array blocks resident in VMEM (all operands are tiny, no grid needed).
    return pl.BlockSpec(memory_space=pltpu.MemorySpace.VMEM)


def _round_up(x, m):
    return ((x + m - 1) // m) * m


def _conv_out_hw(h, w):
    # 3x3, stride 2, pad 1
    return (h - 1) // 2 + 1, (w - 1) // 2 + 1


def _gather_mats(batch, h, w):
    """0/1 selection matrices G_k (k = kh*3+kw) implementing im2col of a 3x3/stride-2/
    pad-1 conv for an activation laid out row-major as (batch*h*w, C)."""
    ho, wo = _conv_out_hw(h, w)
    g = np.zeros((9, batch * ho * wo, batch * h * w), np.float32)
    for b in range(batch):
        for oh in range(ho):
            for ow in range(wo):
                m = (b * ho + oh) * wo + ow
                for kh in range(3):
                    for kw in range(3):
                        hi = 2 * oh + kh - 1
                        wi = 2 * ow + kw - 1
                        if 0 <= hi < h and 0 <= wi < w:
                            g[kh * 3 + kw, m, (b * h + hi) * w + wi] = 1.0
    return g


def _pack_rows(parts, lanes, row_align=8):
    """Stack 2-D numpy parts into one (rows, lanes) row-band buffer.

    Every band starts at a row multiple of `row_align` so in-kernel static slices stay
    sublane-aligned.  Returns (buffer, band_row_offsets)."""
    offs, rows = [], 0
    for p in parts:
        rows = _round_up(rows, row_align)
        offs.append(rows)
        rows += p.shape[0]
    rows = _round_up(rows, row_align)
    buf = np.zeros((rows, lanes), np.float32)
    for off, p in zip(offs, parts):
        buf[off:off + p.shape[0], :p.shape[1]] = p
    return buf, offs


def im2col_3x3_s2_p1(x_nhwc):
    """(B,H,W,C) -> (B*Ho*Wo, 9*C) patches; column = (kh*3+kw)*C + c."""
    b, h, w, c = x_nhwc.shape
    ho, wo = _conv_out_hw(h, w)
    xp = jnp.pad(x_nhwc, ((0, 0), (1, 1), (1, 1), (0, 0)))
    pieces = [xp[:, kh:kh + 2 * ho:2, kw:kw + 2 * wo:2, :]
              for kh in range(3) for kw in range(3)]
    return jnp.stack(pieces, axis=3).reshape(b * ho * wo, 9 * c)


# ----------------------------------------------------------------------------
# Build the fused forward (prep + kernel + wrapper)
# ----------------------------------------------------------------------------
def build_fire_clip(params, batch, height, width):
    h1, w1 = _conv_out_hw(height, width)
    h2, w2 = _conv_out_hw(h1, w1)
    h3, w3 = _conv_out_hw(h2, w2)

    cin1 = params["conv1_w"].shape[1]          # 3
    c1 = params["conv1_w"].shape[0]            # 16
    c2 = params["conv2_w"].shape[0]            # 32
    c3 = params["conv3_w"].shape[0]            # 64
    ed = params["fc_w"].shape[0]               # embedding dim (128)
    ncls = params["cls_emb"].shape[0]          # 2

    n1 = batch * h1 * w1                       # conv1 output rows (128)
    m2 = batch * h2 * w2                       # conv2 output rows (32)
    m3 = batch * h3 * w3                       # conv3 output rows (8)

    # --- conv1 as an im2col matmul; bias folded into the zero-padded contraction ---
    k1 = 9 * cin1                              # 27
    k1p = _round_up(k1 + 1, 8)                 # 32; patch column k1 carries constant 1.0
    w1_np = np.asarray(params["conv1_w"], np.float32)
    w1_aug = np.zeros((k1p, c1), np.float32)
    w1_aug[:k1] = w1_np.transpose(2, 3, 1, 0).reshape(k1, c1)
    w1_aug[k1] = np.asarray(params["conv1_b"], np.float32)

    def conv_w_vstack(w):                      # (cout,cin,3,3) -> (9*cin, cout), row = k*cin+c
        w = np.asarray(w, np.float32)
        return w.transpose(2, 3, 1, 0).reshape(9 * w.shape[1], w.shape[0])

    w2v = conv_w_vstack(params["conv2_w"])     # (144, 32)
    w3v = conv_w_vstack(params["conv3_w"])     # (288, 64)
    b2 = np.asarray(params["conv2_b"], np.float32).reshape(1, c2)
    b3 = np.asarray(params["conv3_b"], np.float32).reshape(1, c3)

    # --- gather (im2col-on-the-MXU) matrices, stacked k-major: row = k*M + m ---
    g2 = _gather_mats(batch, h1, w1).reshape(9 * m2, n1)   # (288, 128)
    g3 = _gather_mats(batch, h2, w2).reshape(9 * m3, m2)   # (72, 32)

    # --- adaptive average pool as a tiny matmul ---
    pool = np.zeros((batch, m3), np.float32)
    for bi in range(batch):
        pool[bi, bi * h3 * w3:(bi + 1) * h3 * w3] = 1.0 / (h3 * w3)

    # --- fc / class embeddings (classes pre-normalized, padded to 128 lanes) ---
    wfc_t = np.asarray(params["fc_w"], np.float32).T       # (64, ed)
    bfc = np.asarray(params["fc_b"], np.float32).reshape(1, ed)
    cls = np.asarray(params["cls_emb"], np.float32)
    cls_n = cls / np.maximum(np.linalg.norm(cls, axis=1, keepdims=True), 1e-12)
    ncp = _round_up(max(ncls, 1), 128)                      # lane-dense logits store
    cls_t = np.zeros((ed, ncp), np.float32)
    cls_t[:, :ncls] = cls_n.T

    # --- pack all constants into 3 VMEM operands (3 input DMAs instead of 12) ---
    gp_np, (g2_off, g3_off) = _pack_rows([g2, g3], lanes=n1, row_align=16)
    gp = jnp.asarray(gp_np, jnp.bfloat16)      # 0/1 entries -> bf16 exact, half the bytes

    wn_lanes = max(c1, c2, c3, m3)
    wn_np, (w1_off, w2_off, b2_off, w3_off, b3_off, pool_off) = _pack_rows(
        [w1_aug, w2v, b2, w3v, b3, pool], lanes=wn_lanes, row_align=8)
    wn = jnp.asarray(wn_np, jnp.float32)

    ww_lanes = max(ed, ncp)
    ww_np, (fc_off, bfc_off, cls_off) = _pack_rows(
        [wfc_t, bfc, cls_t], lanes=ww_lanes, row_align=8)
    ww = jnp.asarray(ww_np, jnp.float32)

    f32 = jnp.float32

    # ------------------------------------------------------------------ kernel ---
    def kernel(patches_ref, gp_ref, wn_ref, ww_ref, o_ref):
        # conv1 + bias + relu: one MXU matmul (bias rides in the padded contraction).
        w1 = wn_ref[w1_off:w1_off + k1p, 0:c1]
        y = jnp.maximum(
            jnp.dot(patches_ref[...], w1, preferred_element_type=f32), 0.0)

        # conv2 / conv3: one stacked gather matmul (im2col done on the MXU), then 9
        # per-tap weight matmuls accumulated in f32 vregs.  All slices are static and
        # 8-row aligned (cheap views); G is upcast bf16 -> f32 (exact 0/1 values).
        for (g_off, gm, w_off, ci, co, b_off) in (
                (g2_off, m2, w2_off, c1, c2, b2_off),
                (g3_off, m3, w3_off, c2, c3, b3_off)):
            g = gp_ref[g_off:g_off + 9 * gm, 0:y.shape[0]].astype(f32)
            t = jnp.dot(g, y, preferred_element_type=f32)          # (9*gm, ci)
            acc = jnp.dot(t[0:gm, :], wn_ref[w_off:w_off + ci, 0:co],
                          preferred_element_type=f32)
            for k in range(1, 9):
                acc += jnp.dot(t[k * gm:(k + 1) * gm, :],
                               wn_ref[w_off + k * ci:w_off + (k + 1) * ci, 0:co],
                               preferred_element_type=f32)
            y = jnp.maximum(acc + wn_ref[b_off:b_off + 1, 0:co], 0.0)

        # AdaptiveAvgPool2d((1,1)) over spatial positions: (batch, m3) @ (m3, c3).
        pooled = jnp.dot(wn_ref[pool_off:pool_off + batch, 0:m3], y,
                         preferred_element_type=f32)

        # fc + F.normalize(p=2, dim=1, eps=1e-12); rsqrt(max(ss,eps^2)) == 1/max(||.||,eps)
        emb = jnp.dot(pooled, ww_ref[fc_off:fc_off + c3, 0:ed],
                      preferred_element_type=f32)
        emb = emb + ww_ref[bfc_off:bfc_off + 1, 0:ed]
        ss = jnp.sum(emb * emb, axis=1, keepdims=True)
        emb_n = emb * jax.lax.rsqrt(jnp.maximum(ss, 1e-24))

        # Lane-dense logits against pre-normalized, zero-padded class embeddings.
        o_ref[...] = jnp.dot(emb_n, ww_ref[cls_off:cls_off + ed, 0:ncp],
                             preferred_element_type=f32)

    # ----------------------------------------------------------------- wrapper ---
    def forward(x_nchw):
        if x_nchw.shape != (batch, cin1, height, width):
            raise ValueError(
                f"expected input shape {(batch, cin1, height, width)}, "
                f"got {x_nchw.shape}; the gather/pool operands are baked for it")
        # NCHW -> NHWC, im2col for conv1, pad 27 -> 32 with a constant-1 bias column.
        x = jnp.transpose(x_nchw, (0, 2, 3, 1))
        patches = im2col_3x3_s2_p1(x)                           # (n1, 27)
        patches = jnp.pad(patches, ((0, 0), (0, k1p - k1)))
        patches = patches.at[:, k1].set(1.0)                    # bias column

        logits_pad = pl.pallas_call(
            kernel,
            out_shape=jax.ShapeDtypeStruct((batch, ncp), jnp.float32),
            in_specs=[_vmem_spec()] * 4,
            out_specs=_vmem_spec(),
        )(patches, gp, wn, ww)
        return logits_pad[:, :ncls]

    return forward


# ----------------------------------------------------------------------------
# Pure-JAX reference
# ----------------------------------------------------------------------------
def reference_forward(params, x_nchw):
    x = x_nchw
    for i in (1, 2, 3):
        w = params[f"conv{i}_w"]
        b = params[f"conv{i}_b"]
        x = jax.lax.conv_general_dilated(
            x, w, window_strides=(2, 2), padding=((1, 1), (1, 1)),
            dimension_numbers=("NCHW", "OIHW", "NCHW"))
        x = jnp.maximum(x + b[None, :, None, None], 0.0)
    pooled = jnp.mean(x, axis=(2, 3))
    emb = pooled @ params["fc_w"].T + params["fc_b"]
    emb_n = emb / jnp.maximum(jnp.linalg.norm(emb, axis=1, keepdims=True), 1e-12)
    cls = params["cls_emb"]
    cls_n = cls / jnp.maximum(jnp.linalg.norm(cls, axis=1, keepdims=True), 1e-12)
    return emb_n @ cls_n.T


# ----------------------------------------------------------------------------
# Parameters (deterministic synthetic init, PyTorch-compatible shapes)
# ----------------------------------------------------------------------------
def init_params(key, embedding_dim=128, num_classes=2):
    ks = jax.random.split(key, 10)

    def nrm(k, shape, scale):
        return (jax.random.normal(k, shape, jnp.float32) * scale).astype(jnp.float32)

    return {
        "conv1_w": nrm(ks[0], (16, 3, 3, 3), 0.2),   "conv1_b": nrm(ks[1], (16,), 0.05),
        "conv2_w": nrm(ks[2], (32, 16, 3, 3), 0.1),  "conv2_b": nrm(ks[3], (32,), 0.05),
        "conv3_w": nrm(ks[4], (64, 32, 3, 3), 0.1),  "conv3_b": nrm(ks[5], (64,), 0.05),
        "fc_w":    nrm(ks[6], (embedding_dim, 64), 0.1),
        "fc_b":    nrm(ks[7], (embedding_dim,), 0.05),
        "cls_emb": nrm(ks[8], (num_classes, embedding_dim), 1.0),  # torch.randn
    }


if __name__ == "__main__":
    key = jax.random.PRNGKey(0)
    pkey, xkey = jax.random.split(key)
    params = init_params(pkey, embedding_dim=128, num_classes=2)

    # Small input consistent with the module: batch=2, 3 channels, 16x16 image.
    x = jax.random.normal(xkey, (2, 3, 16, 16), jnp.float32)

    forward = jax.jit(build_fire_clip(params, batch=2, height=16, width=16))
    logits = forward(x)
    jax.block_until_ready(logits)

    ref = reference_forward(params, x)
    np.testing.assert_allclose(np.asarray(logits), np.asarray(ref),
                               rtol=2e-4, atol=5e-5)
    assert logits.shape == (2, 2)
    print("KERNEL_OK")
</pallas_src>

<mosaic_0001>
module attributes {stable_mosaic.version = 11 : i64} {
  func.func @kernel(%arg0: memref<128x32xf32, #tpu.memory_space<vmem>>, %arg1: memref<368x128xbf16, #tpu.memory_space<vmem>>, %arg2: memref<488x64xf32, #tpu.memory_space<vmem>>, %arg3: memref<200x128xf32, #tpu.memory_space<vmem>>, %arg4: memref<2x128xf32, #tpu.memory_space<vmem>>) attributes {dimension_semantics = [], scalar_prefetch = 0 : i64, scratch_operands = 0 : i64, tpu.core_type = #tpu.core_type<tc>} {
    %c0 = arith.constant 0 : index
    %c0_0 = arith.constant 0 : index
    %0 = vector.load %arg2[%c0, %c0_0] : memref<488x64xf32, #tpu.memory_space<vmem>>, vector<32x16xf32>
    %c0_1 = arith.constant 0 : index
    %c0_2 = arith.constant 0 : index
    %1 = vector.load %arg0[%c0_1, %c0_2] : memref<128x32xf32, #tpu.memory_space<vmem>>, vector<128x32xf32>
    %cst = arith.constant dense<0.000000e+00> : vector<128x16xf32>
    %2 = tpu.matmul %1, %0, %cst {dimension_numbers = #tpu.dot_dimension_numbers<[1], [0], [0], [1], [0, 0, 1, 1], [], []>} : vector<128x32xf32>, vector<32x16xf32>, vector<128x16xf32> -> vector<128x16xf32>
    %cst_3 = arith.constant 0.000000e+00 : f32
    %3 = vector.broadcast %cst_3 : f32 to vector<128x16xf32>
    %4 = arith.maximumf %2, %3 : vector<128x16xf32>
    %c0_4 = arith.constant 0 : index
    %c0_5 = arith.constant 0 : index
    %5 = vector.load %arg1[%c0_4, %c0_5] : memref<368x128xbf16, #tpu.memory_space<vmem>>, vector<288x128xbf16>
    %6 = arith.extf %5 : vector<288x128xbf16> to vector<288x128xf32>
    %cst_6 = arith.constant dense<0.000000e+00> : vector<288x16xf32>
    %7 = tpu.matmul %6, %4, %cst_6 {dimension_numbers = #tpu.dot_dimension_numbers<[1], [0], [0], [1], [0, 0, 1, 1], [], []>} : vector<288x128xf32>, vector<128x16xf32>, vector<288x16xf32> -> vector<288x16xf32>
    %8 = vector.extract_strided_slice %7 {offsets = [0, 0], sizes = [32, 16], strides = [1, 1]} : vector<288x16xf32> to vector<32x16xf32>
    %c32 = arith.constant 32 : index
    %c0_7 = arith.constant 0 : index
    %9 = vector.load %arg2[%c32, %c0_7] : memref<488x64xf32, #tpu.memory_space<vmem>>, vector<16x32xf32>
    %cst_8 = arith.constant dense<0.000000e+00> : vector<32x32xf32>
    %10 = tpu.matmul %8, %9, %cst_8 {dimension_numbers = #tpu.dot_dimension_numbers<[1], [0], [0], [1], [0, 0, 1, 1], [], []>} : vector<32x16xf32>, vector<16x32xf32>, vector<32x32xf32> -> vector<32x32xf32>
    %11 = vector.extract_strided_slice %7 {offsets = [32, 0], sizes = [32, 16], strides = [1, 1]} : vector<288x16xf32> to vector<32x16xf32>
    %c48 = arith.constant 48 : index
    %c0_9 = arith.constant 0 : index
    %12 = vector.load %arg2[%c48, %c0_9] : memref<488x64xf32, #tpu.memory_space<vmem>>, vector<16x32xf32>
    %cst_10 = arith.constant dense<0.000000e+00> : vector<32x32xf32>
    %13 = tpu.matmul %11, %12, %cst_10 {dimension_numbers = #tpu.dot_dimension_numbers<[1], [0], [0], [1], [0, 0, 1, 1], [], []>} : vector<32x16xf32>, vector<16x32xf32>, vector<32x32xf32> -> vector<32x32xf32>
    %14 = arith.addf %10, %13 : vector<32x32xf32>
    %15 = vector.extract_strided_slice %7 {offsets = [64, 0], sizes = [32, 16], strides = [1, 1]} : vector<288x16xf32> to vector<32x16xf32>
    %c64 = arith.constant 64 : index
    %c0_11 = arith.constant 0 : index
    %16 = vector.load %arg2[%c64, %c0_11] : memref<488x64xf32, #tpu.memory_space<vmem>>, vector<16x32xf32>
    %cst_12 = arith.constant dense<0.000000e+00> : vector<32x32xf32>
    %17 = tpu.matmul %15, %16, %cst_12 {dimension_numbers = #tpu.dot_dimension_numbers<[1], [0], [0], [1], [0, 0, 1, 1], [], []>} : vector<32x16xf32>, vector<16x32xf32>, vector<32x32xf32> -> vector<32x32xf32>
    %18 = arith.addf %14, %17 : vector<32x32xf32>
    %19 = vector.extract_strided_slice %7 {offsets = [96, 0], sizes = [32, 16], strides = [1, 1]} : vector<288x16xf32> to vector<32x16xf32>
    %c80 = arith.constant 80 : index
    %c0_13 = arith.constant 0 : index
    %20 = vector.load %arg2[%c80, %c0_13] : memref<488x64xf32, #tpu.memory_space<vmem>>, vector<16x32xf32>
    %cst_14 = arith.constant dense<0.000000e+00> : vector<32x32xf32>
    %21 = tpu.matmul %19, %20, %cst_14 {dimension_numbers = #tpu.dot_dimension_numbers<[1], [0], [0], [1], [0, 0, 1, 1], [], []>} : vector<32x16xf32>, vector<16x32xf32>, vector<32x32xf32> -> vector<32x32xf32>
    %22 = arith.addf %18, %21 : vector<32x32xf32>
    %23 = vector.extract_strided_slice %7 {offsets = [128, 0], sizes = [32, 16], strides = [1, 1]} : vector<288x16xf32> to vector<32x16xf32>
    %c96 = arith.constant 96 : index
    %c0_15 = arith.constant 0 : index
    %24 = vector.load %arg2[%c96, %c0_15] : memref<488x64xf32, #tpu.memory_space<vmem>>, vector<16x32xf32>
    %cst_16 = arith.constant dense<0.000000e+00> : vector<32x32xf32>
    %25 = tpu.matmul %23, %24, %cst_16 {dimension_numbers = #tpu.dot_dimension_numbers<[1], [0], [0], [1], [0, 0, 1, 1], [], []>} : vector<32x16xf32>, vector<16x32xf32>, vector<32x32xf32> -> vector<32x32xf32>
    %26 = arith.addf %22, %25 : vector<32x32xf32>
    %27 = vector.extract_strided_slice %7 {offsets = [160, 0], sizes = [32, 16], strides = [1, 1]} : vector<288x16xf32> to vector<32x16xf32>
    %c112 = arith.constant 112 : index
    %c0_17 = arith.constant 0 : index
    %28 = vector.load %arg2[%c112, %c0_17] : memref<488x64xf32, #tpu.memory_space<vmem>>, vector<16x32xf32>
    %cst_18 = arith.constant dense<0.000000e+00> : vector<32x32xf32>
    %29 = tpu.matmul %27, %28, %cst_18 {dimension_numbers = #tpu.dot_dimension_numbers<[1], [0], [0], [1], [0, 0, 1, 1], [], []>} : vector<32x16xf32>, vector<16x32xf32>, vector<32x32xf32> -> vector<32x32xf32>
    %30 = arith.addf %26, %29 : vector<32x32xf32>
    %31 = vector.extract_strided_slice %7 {offsets = [192, 0], sizes = [32, 16], strides = [1, 1]} : vector<288x16xf32> to vector<32x16xf32>
    %c128 = arith.constant 128 : index
    %c0_19 = arith.constant 0 : index
    %32 = vector.load %arg2[%c128, %c0_19] : memref<488x64xf32, #tpu.memory_space<vmem>>, vector<16x32xf32>
    %cst_20 = arith.constant dense<0.000000e+00> : vector<32x32xf32>
    %33 = tpu.matmul %31, %32, %cst_20 {dimension_numbers = #tpu.dot_dimension_numbers<[1], [0], [0], [1], [0, 0, 1, 1], [], []>} : vector<32x16xf32>, vector<16x32xf32>, vector<32x32xf32> -> vector<32x32xf32>
    %34 = arith.addf %30, %33 : vector<32x32xf32>
    %35 = vector.extract_strided_slice %7 {offsets = [224, 0], sizes = [32, 16], strides = [1, 1]} : vector<288x16xf32> to vector<32x16xf32>
    %c144 = arith.constant 144 : index
    %c0_21 = arith.constant 0 : index
    %36 = vector.load %arg2[%c144, %c0_21] : memref<488x64xf32, #tpu.memory_space<vmem>>, vector<16x32xf32>
    %cst_22 = arith.constant dense<0.000000e+00> : vector<32x32xf32>
    %37 = tpu.matmul %35, %36, %cst_22 {dimension_numbers = #tpu.dot_dimension_numbers<[1], [0], [0], [1], [0, 0, 1, 1], [], []>} : vector<32x16xf32>, vector<16x32xf32>, vector<32x32xf32> -> vector<32x32xf32>
    %38 = arith.addf %34, %37 : vector<32x32xf32>
    %39 = vector.extract_strided_slice %7 {offsets = [256, 0], sizes = [32, 16], strides = [1, 1]} : vector<288x16xf32> to vector<32x16xf32>
    %c160 = arith.constant 160 : index
    %c0_23 = arith.constant 0 : index
    %40 = vector.load %arg2[%c160, %c0_23] : memref<488x64xf32, #tpu.memory_space<vmem>>, vector<16x32xf32>
    %cst_24 = arith.constant dense<0.000000e+00> : vector<32x32xf32>
    %41 = tpu.matmul %39, %40, %cst_24 {dimension_numbers = #tpu.dot_dimension_numbers<[1], [0], [0], [1], [0, 0, 1, 1], [], []>} : vector<32x16xf32>, vector<16x32xf32>, vector<32x32xf32> -> vector<32x32xf32>
    %42 = arith.addf %38, %41 : vector<32x32xf32>
    %c176 = arith.constant 176 : index
    %c0_25 = arith.constant 0 : index
    %43 = vector.load %arg2[%c176, %c0_25] : memref<488x64xf32, #tpu.memory_space<vmem>>, vector<1x32xf32>
    %44 = vector.broadcast %43 : vector<1x32xf32> to vector<32x32xf32>
    %45 = arith.addf %42, %44 : vector<32x32xf32>
    %cst_26 = arith.constant 0.000000e+00 : f32
    %46 = vector.broadcast %cst_26 : f32 to vector<32x32xf32>
    %47 = arith.maximumf %45, %46 : vector<32x32xf32>
    %c288 = arith.constant 288 : index
    %c0_27 = arith.constant 0 : index
    %48 = vector.load %arg1[%c288, %c0_27] : memref<368x128xbf16, #tpu.memory_space<vmem>>, vector<72x32xbf16>
    %49 = arith.extf %48 : vector<72x32xbf16> to vector<72x32xf32>
    %cst_28 = arith.constant dense<0.000000e+00> : vector<72x32xf32>
    %50 = tpu.matmul %49, %47, %cst_28 {dimension_numbers = #tpu.dot_dimension_numbers<[1], [0], [0], [1], [0, 0, 1, 1], [], []>} : vector<72x32xf32>, vector<32x32xf32>, vector<72x32xf32> -> vector<72x32xf32>
    %51 = vector.extract_strided_slice %50 {offsets = [0, 0], sizes = [8, 32], strides = [1, 1]} : vector<72x32xf32> to vector<8x32xf32>
    %c184 = arith.constant 184 : index
    %c0_29 = arith.constant 0 : index
    %52 = vector.load %arg2[%c184, %c0_29] : memref<488x64xf32, #tpu.memory_space<vmem>>, vector<32x64xf32>
    %cst_30 = arith.constant dense<0.000000e+00> : vector<8x64xf32>
    %53 = tpu.matmul %51, %52, %cst_30 {dimension_numbers = #tpu.dot_dimension_numbers<[1], [0], [0], [1], [0, 0, 1, 1], [], []>} : vector<8x32xf32>, vector<32x64xf32>, vector<8x64xf32> -> vector<8x64xf32>
    %54 = vector.extract_strided_slice %50 {offsets = [8, 0], sizes = [8, 32], strides = [1, 1]} : vector<72x32xf32> to vector<8x32xf32>
    %c216 = arith.constant 216 : index
    %c0_31 = arith.constant 0 : index
    %55 = vector.load %arg2[%c216, %c0_31] : memref<488x64xf32, #tpu.memory_space<vmem>>, vector<32x64xf32>
    %cst_32 = arith.constant dense<0.000000e+00> : vector<8x64xf32>
    %56 = tpu.matmul %54, %55, %cst_32 {dimension_numbers = #tpu.dot_dimension_numbers<[1], [0], [0], [1], [0, 0, 1, 1], [], []>} : vector<8x32xf32>, vector<32x64xf32>, vector<8x64xf32> -> vector<8x64xf32>
    %57 = arith.addf %53, %56 : vector<8x64xf32>
    %58 = vector.extract_strided_slice %50 {offsets = [16, 0], sizes = [8, 32], strides = [1, 1]} : vector<72x32xf32> to vector<8x32xf32>
    %c248 = arith.constant 248 : index
    %c0_33 = arith.constant 0 : index
    %59 = vector.load %arg2[%c248, %c0_33] : memref<488x64xf32, #tpu.memory_space<vmem>>, vector<32x64xf32>
    %cst_34 = arith.constant dense<0.000000e+00> : vector<8x64xf32>
    %60 = tpu.matmul %58, %59, %cst_34 {dimension_numbers = #tpu.dot_dimension_numbers<[1], [0], [0], [1], [0, 0, 1, 1], [], []>} : vector<8x32xf32>, vector<32x64xf32>, vector<8x64xf32> -> vector<8x64xf32>
    %61 = arith.addf %57, %60 : vector<8x64xf32>
    %62 = vector.extract_strided_slice %50 {offsets = [24, 0], sizes = [8, 32], strides = [1, 1]} : vector<72x32xf32> to vector<8x32xf32>
    %c280 = arith.constant 280 : index
    %c0_35 = arith.constant 0 : index
    %63 = vector.load %arg2[%c280, %c0_35] : memref<488x64xf32, #tpu.memory_space<vmem>>, vector<32x64xf32>
    %cst_36 = arith.constant dense<0.000000e+00> : vector<8x64xf32>
    %64 = tpu.matmul %62, %63, %cst_36 {dimension_numbers = #tpu.dot_dimension_numbers<[1], [0], [0], [1], [0, 0, 1, 1], [], []>} : vector<8x32xf32>, vector<32x64xf32>, vector<8x64xf32> -> vector<8x64xf32>
    %65 = arith.addf %61, %64 : vector<8x64xf32>
    %66 = vector.extract_strided_slice %50 {offsets = [32, 0], sizes = [8, 32], strides = [1, 1]} : vector<72x32xf32> to vector<8x32xf32>
    %c312 = arith.constant 312 : index
    %c0_37 = arith.constant 0 : index
    %67 = vector.load %arg2[%c312, %c0_37] : memref<488x64xf32, #tpu.memory_space<vmem>>, vector<32x64xf32>
    %cst_38 = arith.constant dense<0.000000e+00> : vector<8x64xf32>
    %68 = tpu.matmul %66, %67, %cst_38 {dimension_numbers = #tpu.dot_dimension_numbers<[1], [0], [0], [1], [0, 0, 1, 1], [], []>} : vector<8x32xf32>, vector<32x64xf32>, vector<8x64xf32> -> vector<8x64xf32>
    %69 = arith.addf %65, %68 : vector<8x64xf32>
    %70 = vector.extract_strided_slice %50 {offsets = [40, 0], sizes = [8, 32], strides = [1, 1]} : vector<72x32xf32> to vector<8x32xf32>
    %c344 = arith.constant 344 : index
    %c0_39 = arith.constant 0 : index
    %71 = vector.load %arg2[%c344, %c0_39] : memref<488x64xf32, #tpu.memory_space<vmem>>, vector<32x64xf32>
    %cst_40 = arith.constant dense<0.000000e+00> : vector<8x64xf32>
    %72 = tpu.matmul %70, %71, %cst_40 {dimension_numbers = #tpu.dot_dimension_numbers<[1], [0], [0], [1], [0, 0, 1, 1], [], []>} : vector<8x32xf32>, vector<32x64xf32>, vector<8x64xf32> -> vector<8x64xf32>
    %73 = arith.addf %69, %72 : vector<8x64xf32>
    %74 = vector.extract_strided_slice %50 {offsets = [48, 0], sizes = [8, 32], strides = [1, 1]} : vector<72x32xf32> to vector<8x32xf32>
    %c376 = arith.constant 376 : index
    %c0_41 = arith.constant 0 : index
    %75 = vector.load %arg2[%c376, %c0_41] : memref<488x64xf32, #tpu.memory_space<vmem>>, vector<32x64xf32>
    %cst_42 = arith.constant dense<0.000000e+00> : vector<8x64xf32>
    %76 = tpu.matmul %74, %75, %cst_42 {dimension_numbers = #tpu.dot_dimension_numbers<[1], [0], [0], [1], [0, 0, 1, 1], [], []>} : vector<8x32xf32>, vector<32x64xf32>, vector<8x64xf32> -> vector<8x64xf32>
    %77 = arith.addf %73, %76 : vector<8x64xf32>
    %78 = vector.extract_strided_slice %50 {offsets = [56, 0], sizes = [8, 32], strides = [1, 1]} : vector<72x32xf32> to vector<8x32xf32>
    %c408 = arith.constant 408 : index
    %c0_43 = arith.constant 0 : index
    %79 = vector.load %arg2[%c408, %c0_43] : memref<488x64xf32, #tpu.memory_space<vmem>>, vector<32x64xf32>
    %cst_44 = arith.constant dense<0.000000e+00> : vector<8x64xf32>
    %80 = tpu.matmul %78, %79, %cst_44 {dimension_numbers = #tpu.dot_dimension_numbers<[1], [0], [0], [1], [0, 0, 1, 1], [], []>} : vector<8x32xf32>, vector<32x64xf32>, vector<8x64xf32> -> vector<8x64xf32>
    %81 = arith.addf %77, %80 : vector<8x64xf32>
    %82 = vector.extract_strided_slice %50 {offsets = [64, 0], sizes = [8, 32], strides = [1, 1]} : vector<72x32xf32> to vector<8x32xf32>
    %c440 = arith.constant 440 : index
    %c0_45 = arith.constant 0 : index
    %83 = vector.load %arg2[%c440, %c0_45] : memref<488x64xf32, #tpu.memory_space<vmem>>, vector<32x64xf32>
    %cst_46 = arith.constant dense<0.000000e+00> : vector<8x64xf32>
    %84 = tpu.matmul %82, %83, %cst_46 {dimension_numbers = #tpu.dot_dimension_numbers<[1], [0], [0], [1], [0, 0, 1, 1], [], []>} : vector<8x32xf32>, vector<32x64xf32>, vector<8x64xf32> -> vector<8x64xf32>
    %85 = arith.addf %81, %84 : vector<8x64xf32>
    %c472 = arith.constant 472 : index
    %c0_47 = arith.constant 0 : index
    %86 = vector.load %arg2[%c472, %c0_47] : memref<488x64xf32, #tpu.memory_space<vmem>>, vector<1x64xf32>
    %87 = vector.broadcast %86 : vector<1x64xf32> to vector<8x64xf32>
    %88 = arith.addf %85, %87 : vector<8x64xf32>
    %cst_48 = arith.constant 0.000000e+00 : f32
    %89 = vector.broadcast %cst_48 : f32 to vector<8x64xf32>
    %90 = arith.maximumf %88, %89 : vector<8x64xf32>
    %c480 = arith.constant 480 : index
    %c0_49 = arith.constant 0 : index
    %91 = vector.load %arg2[%c480, %c0_49] : memref<488x64xf32, #tpu.memory_space<vmem>>, vector<2x8xf32>
    %cst_50 = arith.constant dense<0.000000e+00> : vector<2x64xf32>
    %92 = tpu.matmul %91, %90, %cst_50 {dimension_numbers = #tpu.dot_dimension_numbers<[1], [0], [0], [1], [0, 0, 1, 1], [], []>} : vector<2x8xf32>, vector<8x64xf32>, vector<2x64xf32> -> vector<2x64xf32>
    %c0_51 = arith.constant 0 : index
    %c0_52 = arith.constant 0 : index
    %93 = vector.load %arg3[%c0_51, %c0_52] : memref<200x128xf32, #tpu.memory_space<vmem>>, vector<64x128xf32>
    %cst_53 = arith.constant dense<0.000000e+00> : vector<2x128xf32>
    %94 = tpu.matmul %92, %93, %cst_53 {dimension_numbers = #tpu.dot_dimension_numbers<[1], [0], [0], [1], [0, 0, 1, 1], [], []>} : vector<2x64xf32>, vector<64x128xf32>, vector<2x128xf32> -> vector<2x128xf32>
    %c64_54 = arith.constant 64 : index
    %c0_55 = arith.constant 0 : index
    %95 = vector.load %arg3[%c64_54, %c0_55] : memref<200x128xf32, #tpu.memory_space<vmem>>, vector<1x128xf32>
    %96 = vector.broadcast %95 : vector<1x128xf32> to vector<2x128xf32>
    %97 = arith.addf %94, %96 : vector<2x128xf32>
    %98 = arith.mulf %97, %97 : vector<2x128xf32>
    %cst_56 = arith.constant dense<0.000000e+00> : vector<2xf32>
    %99 = vector.multi_reduction <add>, %98, %cst_56 [1] : vector<2x128xf32> to vector<2xf32>
    %100 = vector.shape_cast %99 : vector<2xf32> to vector<2x1xf32>
    %cst_57 = arith.constant 1.000000e-24 : f32
    %101 = vector.broadcast %cst_57 : f32 to vector<2x1xf32>
    %102 = arith.maximumf %100, %101 : vector<2x1xf32>
    %103 = math.rsqrt %102 : vector<2x1xf32>
    %104 = vector.broadcast %103 : vector<2x1xf32> to vector<2x128xf32>
    %105 = arith.mulf %97, %104 : vector<2x128xf32>
    %c72 = arith.constant 72 : index
    %c0_58 = arith.constant 0 : index
    %106 = vector.load %arg3[%c72, %c0_58] : memref<200x128xf32, #tpu.memory_space<vmem>>, vector<128x128xf32>
    %cst_59 = arith.constant dense<0.000000e+00> : vector<2x128xf32>
    %107 = tpu.matmul %105, %106, %cst_59 {dimension_numbers = #tpu.dot_dimension_numbers<[1], [0], [0], [1], [0, 0, 1, 1], [], []>} : vector<2x128xf32>, vector<128x128xf32>, vector<2x128xf32> -> vector<2x128xf32>
    %c0_60 = arith.constant 0 : index
    %c0_61 = arith.constant 0 : index
    %108 = vector.load %arg4[%c0_60, %c0_61] : memref<2x128xf32, #tpu.memory_space<vmem>>, vector<2x128xf32>
    tpu.vector_store %arg4[%c0_60, %c0_61], %107 {strides = array<i32>} : memref<2x128xf32, #tpu.memory_space<vmem>>, vector<2x128xf32>,
    return
  }
}

</mosaic_0001>

<bundles_post_ra>
// kernel: forward.1
= control target key start
LH: loop header
LB: loop body
LE: loop exit
PB: predicated region body
PF: predicated region fallthrough
CT: control target
= control target key end

     0   :  { %vm38_vm0 = vcmask 261120   ;;  %s4247_s0 = inlined_call_operand.vmem [shape: f32[128,32], index: 0, kind: input, shape index: {}]   ;;  %s4248_s1 = inlined_call_operand.vmem [shape: bf16[368,128], index: 1, kind: input, shape index: {}]   ;;  %s4249_s2 = inlined_call_operand.vmem [shape: f32[488,64], index: 2, kind: input, shape index: {}]   ;;  %s4250_s3 = inlined_call_operand.vmem [shape: f32[200,128], index: 3, kind: input, shape index: {}]   ;;  %s4251_s4 = inlined_call_operand.hbm [shape: f32[2,128], index: 4, kind: output, shape index: {}]  }
   0x1   :  { %v18_v0 = vld [vmem:[%s4249_s2] sm:$0xff]  ;;  %v19_v1 = vld [vmem:[%s4249_s2 + $0x8] sm:$0xff]  ;;  %v20_v2 = vld [vmem:[%s4249_s2 + $0x10] sm:$0xff] }
   0x2   :  { %v3428_v3 = vpack.c.bf16 %v19_v1, %v18_v0  ;;  %v21_v4 = vld [vmem:[%s4249_s2 + $0x18] sm:$0xff]  ;;  %v22_v5 = vld [vmem:[%s4247_s0] sm:$0xff] }
   0x3   :  { %v3432_v6 = vpack.c.bf16 %v21_v4, %v20_v2  ;;  %3035 = vmatprep.mubr.msk.f32.mxu0 %vm38_vm0, %v22_v5 }
   0x4   :  { %3429 = vmatprep.subr.bf16.mxu0 %v3428_v3 }
   0x5   :  { %3431 = vmatpush3.bf16.msra.mxu0 %v3428_v3 }
   0x6   :  { %3433 = vmatprep.subr.bf16.mxu0 %v3432_v6 }
   0x7   :  { %9 = vsyncpa [#allocation3], 0  ;;  %v23_v7 = vld [vmem:[%s4247_s0 + $0x8] sm:$0xff]  ;;  %v24_v8 = vld [vmem:[%s4247_s0 + $0x10] sm:$0xff]  ;;  %vm569_vm1 = vcmask 130048   ;;  %vm3679_vm2 = vmmov 0  }
   0x8   :  { %v25_v9 = vld [vmem:[%s4247_s0 + $0x18] sm:$0xff]  ;;  %v26_v10 = vld [vmem:[%s4247_s0 + $0x20] sm:$0xff]  ;;  %v27_v11 = vld [vmem:[%s4247_s0 + $0x28] sm:$0xff]  ;;  %vm2361_vm3 = vcmask 64512   ;;  %vm2448_vm4 = vcmask 523264   ;;  %vm2523_vm5 = vcmask 1041408  }
   0x9   :  { %3435 = vmatpush3.bf16.msra.mxu0 %v3432_v6  ;;  %v28_v12 = vld [vmem:[%s4247_s0 + $0x30] sm:$0xff]  ;;  %v29_v13 = vld [vmem:[%s4247_s0 + $0x38] sm:$0xff]  ;;  %v30_v14 = vld [vmem:[%s4247_s0 + $0x40] sm:$0xff] }
   0xa   :  { %v31_v15 = vld [vmem:[%s4247_s0 + $0x48] sm:$0xff]  ;;  %v32_v16 = vld [vmem:[%s4247_s0 + $0x50] sm:$0xff]  ;;  %v33_v17 = vld [vmem:[%s4247_s0 + $0x58] sm:$0xff] }
   0xb   :  { %v34_v18 = vld [vmem:[%s4247_s0 + $0x60] sm:$0xff]  ;;  %v35_v19 = vld [vmem:[%s4247_s0 + $0x68] sm:$0xff]  ;;  %v36_v20 = vld [vmem:[%s4247_s0 + $0x70] sm:$0xff] }
   0xc   :  { %3036 = vmatmul.mubr.msk.f32.vlgmr.msra.gmra.mrb[0].mxu0 %vm38_vm0, %v23_v7  ;;  %v37_v21 = vld [vmem:[%s4247_s0 + $0x78] sm:$0xff]  ;;  %v3786_v22 = vld [vmem:[%s4248_s1 + $0x10] sm:$0xff]   ;;  %v3792_v24 = vld [vmem:[%s4248_s1] sm:$0xff]  }
   0xd   :  { %3038 = vmatprep.mubr.msk.f32.mxu0 %vm38_vm0, %v24_v8  ;;  %v2716_v23 = vunpack.c.l.bf16 %v3786_v22  ;;  %v2708_v25 = vunpack.c.l.bf16 %v3792_v24  ;;  %v567_v0 = vld [vmem:[%s4249_s2 + $0x30] sm:$0xff]  ;;  %v568_v1 = vld [vmem:[%s4249_s2 + $0x38] sm:$0xff]  ;;  %v2794_v5 = vld [vmem:[%s4248_s1 + $0x8] sm:$0xff]   ;;  %v2717_v7 = vunpack.c.h.bf16 %v3786_v22  ;;  %v2709_v8 = vunpack.c.h.bf16 %v3792_v24 }
   0xe   :  { %v2796_v4 = vld [vmem:[%s4248_s1 + $0x18] sm:$0xff]   ;;  %v3468_v6 = vpack.c.bf16 %v568_v1, %v567_v0  ;;  %v2801_v24 = vld [vmem:[%s4248_s1 + $0x40] sm:$0xff]  }
   0xf   :  { %3097 = vmatprep.mubr.f32.mxu1 %v2716_v23 }
  0x10   :  { %3039 = vmatmul.mubr.msk.f32.gmra.mrb[2].mxu0 %vm38_vm0, %v25_v9  ;;  %v2720_v9 = vunpack.c.l.bf16 %v2796_v4 }
  0x11   :  { %3041 = vmatprep.mubr.msk.f32.mxu0 %vm38_vm0, %v26_v10  ;;  %v2712_v10 = vunpack.c.l.bf16 %v2794_v5 }
  0x14   :  { %3042 = vmatmul.mubr.msk.f32.gmra.mrb[4].mxu0 %vm38_vm0, %v27_v11  ;;  %v2797_v11 = vld [vmem:[%s4248_s1 + $0x20] sm:$0xff]  }
  0x15   :  { %3044 = vmatprep.mubr.msk.f32.mxu0 %vm38_vm0, %v28_v12  ;;  %v2721_v12 = vunpack.c.h.bf16 %v2796_v4 }
  0x18   :  { %3045 = vmatmul.mubr.msk.f32.gmra.mrb[6].mxu0 %vm38_vm0, %v29_v13  ;;  %v2713_v13 = vunpack.c.h.bf16 %v2794_v5  ;;  %v867_v5 = vld [vmem:[%s4249_s2 + $0x50] sm:$0xff] }
  0x19   :  { %3047 = vmatprep.mubr.msk.f32.mxu0 %vm38_vm0, %v30_v14  ;;  %v2724_v14 = vunpack.c.l.bf16 %v2797_v11 }
  0x1c   :  { %3048 = vmatmul.mubr.msk.f32.gmra.mrb[8].mxu0 %vm38_vm0, %v31_v15  ;;  %v2798_v15 = vld [vmem:[%s4248_s1 + $0x28] sm:$0xff]  }
  0x1d   :  { %3050 = vmatprep.mubr.msk.f32.mxu0 %vm38_vm0, %v32_v16  ;;  %v2725_v16 = vunpack.c.h.bf16 %v2797_v11 }
  0x20   :  { %3051 = vmatmul.mubr.msk.f32.gmra.mrb[10].mxu0 %vm38_vm0, %v33_v17  ;;  %v2728_v17 = vunpack.c.l.bf16 %v2798_v15 }
  0x21   :  { %3053 = vmatprep.mubr.msk.f32.mxu0 %vm38_vm0, %v34_v18  ;;  %v2799_v18 = vld [vmem:[%s4248_s1 + $0x30] sm:$0xff]  }
  0x22   :  { %v2733_v22 = vunpack.c.h.bf16 %v2799_v18 }
  0x24   :  { %3054 = vmatmul.mubr.msk.f32.gmra.mrb[12].mxu0 %vm38_vm0, %v35_v19  ;;  %v2729_v19 = vunpack.c.h.bf16 %v2798_v15 }
  0x25   :  { %3056 = vmatprep.mubr.msk.f32.mxu0 %vm38_vm0, %v36_v20  ;;  %v2732_v20 = vunpack.c.l.bf16 %v2799_v18 }
  0x28   :  { %3057 = vmatmul.mubr.msk.f32.gmra.mrb[14].mxu0 %vm38_vm0, %v37_v21  ;;  %v2800_v21 = vld [vmem:[%s4248_s1 + $0x38] sm:$0xff]  }
  0x29   :  { %3091 = vmatprep.mubr.f32.mxu0 %v2708_v25  ;;  %v2736_v23 = vunpack.c.l.bf16 %v2800_v21  ;;  %v2737_v25 = vunpack.c.h.bf16 %v2800_v21 }
  0xdf   :  { %v3037_v26 = vpop.f32.mrb[0].mxu0 }
  0xe0   :  { %v233_v27 = vmax.f32 %v3037_v26, 0.0  ;;  %v153_v28 = vpop.f32.mrb[1].mxu0  ;;  %v2740_v26 = vunpack.c.l.bf16 %v2801_v24 }
  0xe1   :  { %v232_v29 = vmax.f32 %v153_v28, 0.0  ;;  %v2741_v28 = vunpack.c.h.bf16 %v2801_v24 }
  0xe3   :  { %v3436_v30 = vpack.c.bf16 %v233_v27, %v232_v29  ;;  %v3040_v31 = vpop.f32.mrb[2].mxu0  ;;  %v2802_v27 = vld [vmem:[%s4248_s1 + $0x48] sm:$0xff]  }
  0xe4   :  { %v235_v32 = vmax.f32 %v3040_v31, 0.0  ;;  %v163_v33 = vpop.f32.mrb[3].mxu0  ;;  %v2744_v29 = vunpack.c.l.bf16 %v2802_v27  ;;  %v2745_v31 = vunpack.c.h.bf16 %v2802_v27  ;;  %v1177_v27 = vld [vmem:[%s4249_s2 + $0x88] sm:$0xff] }
  0xe5   :  { %v234_v34 = vmax.f32 %v163_v33, 0.0  ;;  %3437 = vmatprep.subr.bf16.mxu0 %v3436_v30  ;;  %3600 = vmatprep.subr.bf16.mxu1 %v3436_v30  ;;  %v2804_v33 = vld [vmem:[%s4248_s1 + $0x58] sm:$0xff]  }
  0xe6   :  { %3439 = vmatpush3.bf16.msra.mxu0 %v3436_v30  ;;  %3608 = vmatpush3.bf16.msra.mxu1 %v3436_v30  ;;  %v2803_v30 = vld [vmem:[%s4248_s1 + $0x50] sm:$0xff]  }
  0xe7   :  { %v3440_v35 = vpack.c.bf16 %v235_v32, %v234_v34  ;;  %v3043_v36 = vpop.f32.mrb[4].mxu0  ;;  %v2748_v32 = vunpack.c.l.bf16 %v2803_v30  ;;  %v2749_v34 = vunpack.c.h.bf16 %v2803_v30 }
  0xe8   :  { %v237_v37 = vmax.f32 %v3043_v36, 0.0  ;;  %v173_v38 = vpop.f32.mrb[5].mxu0  ;;  %v2805_v36 = vld [vmem:[%s4248_s1 + $0x60] sm:$0xff]  }
  0xe9   :  { %v236_v39 = vmax.f32 %v173_v38, 0.0  ;;  %3441 = vmatprep.subr.bf16.mxu0 %v3440_v35  ;;  %3601 = vmatprep.subr.bf16.mxu1 %v3440_v35  ;;  %v2756_v38 = vunpack.c.l.bf16 %v2805_v36 }
  0xea   :  { %3443 = vmatpush3.bf16.msra.mxu0 %v3440_v35  ;;  %3609 = vmatpush3.bf16.msra.mxu1 %v3440_v35  ;;  %v2752_v35 = vunpack.c.l.bf16 %v2804_v33 }
  0xeb   :  { %v3444_v40 = vpack.c.bf16 %v237_v37, %v236_v39  ;;  %v3046_v41 = vpop.f32.mrb[6].mxu0  ;;  %v2753_v37 = vunpack.c.h.bf16 %v2804_v33  ;;  %v2806_v39 = vld [vmem:[%s4248_s1 + $0x68] sm:$0xff]   ;;  %v1279_v33 = vld [vmem:[%s4249_s2 + $0x90] sm:$0xff] }
  0xec   :  { %v239_v42 = vmax.f32 %v3046_v41, 0.0  ;;  %v183_v43 = vpop.f32.mrb[7].mxu0  ;;  %v2760_v41 = vunpack.c.l.bf16 %v2806_v39 }
  0xed   :  { %v238_v44 = vmax.f32 %v183_v43, 0.0  ;;  %3445 = vmatprep.subr.bf16.mxu0 %v3444_v40  ;;  %3602 = vmatprep.subr.bf16.mxu1 %v3444_v40  ;;  %v2761_v43 = vunpack.c.h.bf16 %v2806_v39 }
  0xee   :  { %3447 = vmatpush3.bf16.msra.mxu0 %v3444_v40  ;;  %3610 = vmatpush3.bf16.msra.mxu1 %v3444_v40  ;;  %v2757_v40 = vunpack.c.h.bf16 %v2805_v36 }
  0xef   :  { %v3448_v45 = vpack.c.bf16 %v239_v42, %v238_v44  ;;  %v3049_v46 = vpop.f32.mrb[8].mxu0  ;;  %v2807_v42 = vld [vmem:[%s4248_s1 + $0x70] sm:$0xff]  }
  0xf0   :  { %v241_v47 = vmax.f32 %v3049_v46, 0.0  ;;  %v193_v48 = vpop.f32.mrb[9].mxu0  ;;  %v2764_v44 = vunpack.c.l.bf16 %v2807_v42  ;;  %v2765_v46 = vunpack.c.h.bf16 %v2807_v42 }
  0xf1   :  { %v240_v49 = vmax.f32 %v193_v48, 0.0  ;;  %3449 = vmatprep.subr.bf16.mxu0 %v3448_v45  ;;  %3603 = vmatprep.subr.bf16.mxu1 %v3448_v45  ;;  %v2809_v48 = vld [vmem:[%s4248_s1 + $0x80] sm:$0xff]  }
  0xf2   :  { %3451 = vmatpush3.bf16.msra.mxu0 %v3448_v45  ;;  %3611 = vmatpush3.bf16.msra.mxu1 %v3448_v45  ;;  %v2808_v45 = vld [vmem:[%s4248_s1 + $0x78] sm:$0xff]  }
  0xf3   :  { %v3452_v50 = vpack.c.bf16 %v241_v47, %v240_v49  ;;  %v3052_v51 = vpop.f32.mrb[10].mxu0  ;;  %v2768_v47 = vunpack.c.l.bf16 %v2808_v45  ;;  %v2769_v49 = vunpack.c.h.bf16 %v2808_v45 }
  0xf4   :  { %v243_v52 = vmax.f32 %v3052_v51, 0.0  ;;  %v203_v53 = vpop.f32.mrb[11].mxu0  ;;  %v2810_v51 = vld [vmem:[%s4248_s1 + $0x88] sm:$0xff]  }
  0xf5   :  { %v242_v54 = vmax.f32 %v203_v53, 0.0  ;;  %3453 = vmatprep.subr.bf16.mxu0 %v3452_v50  ;;  %3604 = vmatprep.subr.bf16.mxu1 %v3452_v50  ;;  %v2776_v53 = vunpack.c.l.bf16 %v2810_v51 }
  0xf6   :  { %3455 = vmatpush3.bf16.msra.mxu0 %v3452_v50  ;;  %3612 = vmatpush3.bf16.msra.mxu1 %v3452_v50  ;;  %v2772_v50 = vunpack.c.l.bf16 %v2809_v48 }
  0xf7   :  { %v3456_v55 = vpack.c.bf16 %v243_v52, %v242_v54  ;;  %v3055_v56 = vpop.f32.mrb[12].mxu0  ;;  %v2773_v52 = vunpack.c.h.bf16 %v2809_v48  ;;  %v2777_v54 = vunpack.c.h.bf16 %v2810_v51  ;;  %v3678_v51 = vmov 0.0|0.0  }
  0xf8   :  { %v245_v57 = vmax.f32 %v3055_v56, 0.0  ;;  %v213_v58 = vpop.f32.mrb[13].mxu0  ;;  %v566_v56 = vld [vmem:[%s4249_s2 + $0x28] sm:$0xff] }
  0xf9   :  { %v244_v59 = vmax.f32 %v213_v58, 0.0  ;;  %3457 = vmatprep.subr.bf16.mxu0 %v3456_v55  ;;  %3605 = vmatprep.subr.bf16.mxu1 %v3456_v55  ;;  %v764_v58 = vld [vmem:[%s4249_s2 + $0x40] sm:$0xff] }
  0xfa   :  { %3459 = vmatpush3.bf16.msra.mxu0 %v3456_v55  ;;  %3613 = vmatpush3.bf16.msra.mxu1 %v3456_v55  ;;  %v565_v55 = vld [vmem:[%s4249_s2 + $0x20] sm:$0xff] }
  0xfb   :  { %v3460_v60 = vpack.c.bf16 %v245_v57, %v244_v59  ;;  %v3058_v61 = vpop.f32.mrb[14].mxu0  ;;  %v3472_v57 = vpack.c.bf16 %v566_v56, %v565_v55  ;;  %v765_v59 = vld [vmem:[%s4249_s2 + $0x48] sm:$0xff] }
  0xfc   :  { %v247_v62 = vmax.f32 %v3058_v61, 0.0  ;;  %v223_v63 = vpop.f32.mrb[15].mxu0  ;;  %v3476_v0 = vpack.c.bf16 %v765_v59, %v764_v58  ;;  %v1659_v55 = vld [vmem:[%s4249_s2 + $0xe8] sm:$0xff]  ;;  %v2683_v59 = vld [vmem:[%s4249_s2 + $0xb0] ss:$0 sm:$0xff] }
  0xfd   :  { %v246_v2 = vmax.f32 %v223_v63, 0.0  ;;  %3461 = vmatprep.subr.bf16.mxu0 %v3460_v60  ;;  %3606 = vmatprep.subr.bf16.mxu1 %v3460_v60 }
  0xfe   :  { %3463 = vmatpush3.bf16.msra.mxu0 %v3460_v60  ;;  %3614 = vmatpush3.bf16.msra.mxu1 %v3460_v60 }
  0xff   :  { %v3464_v3 = vpack.c.bf16 %v247_v62, %v246_v2 }
 0x101   :  { %3465 = vmatprep.subr.bf16.mxu0 %v3464_v3  ;;  %3607 = vmatprep.subr.bf16.mxu1 %v3464_v3 }
 0x102   :  { %3467 = vmatpush3.bf16.msra.mxu0 %v3464_v3  ;;  %3615 = vmatpush3.bf16.msra.mxu1 %v3464_v3 }
 0x103   :  { %3469 = vmatprep.subr.bf16.mxu0 %v3468_v6  ;;  %3504 = vmatprep.subr.bf16.mxu1 %v3678_v51 }
 0x105   :  { %3098 = vmatmul.mubr.f32.vlgmr.msra.gmra.mrb[0].mxu1 %v2717_v7  ;;  %3092 = vmatmul.mubr.f32.vlgmr.msra.gmra.mrb[16].mxu0 %v2709_v8 }
 0x106   :  { %3100 = vmatprep.mubr.f32.mxu1 %v2720_v9  ;;  %3094 = vmatprep.mubr.f32.mxu0 %v2712_v10 }
 0x107   :  { %3471 = vmatpush3.bf16.msra.mxu0 %v3468_v6  ;;  %v868_v6 = vld [vmem:[%s4249_s2 + $0x58] sm:$0xff] }
 0x108   :  { %3473 = vmatprep.subr.bf16.mxu0 %v3472_v57  ;;  %v3480_v9 = vpack.c.bf16 %v868_v6, %v867_v5 }
 0x109   :  { %3101 = vmatmul.mubr.f32.gmra.mrb[2].mxu1 %v2721_v12  ;;  %3095 = vmatmul.mubr.f32.gmra.mrb[18].mxu0 %v2713_v13  ;;  %v970_v12 = vld [vmem:[%s4249_s2 + $0x60] sm:$0xff]  ;;  %v971_v13 = vld [vmem:[%s4249_s2 + $0x68] sm:$0xff] }
 0x10a   :  { %3103 = vmatprep.mubr.f32.mxu1 %v2724_v14 }
 0x10d   :  { %3104 = vmatmul.mubr.f32.gmra.mrb[4].mxu1 %v2725_v16  ;;  %v3484_v16 = vpack.c.bf16 %v971_v13, %v970_v12  ;;  %v2812_v13 = vld [vmem:[%s4248_s1 + $0x98] sm:$0xff]  }
 0x10e   :  { %3106 = vmatprep.mubr.f32.mxu1 %v2728_v17 }
 0x111   :  { %3107 = vmatmul.mubr.f32.gmra.mrb[6].mxu1 %v2729_v19  ;;  %v1073_v19 = vld [vmem:[%s4249_s2 + $0x70] sm:$0xff] }
 0x112   :  { %3109 = vmatprep.mubr.f32.mxu1 %v2732_v20  ;;  %v1074_v20 = vld [vmem:[%s4249_s2 + $0x78] sm:$0xff] }
 0x115   :  { %3110 = vmatmul.mubr.f32.gmra.mrb[8].mxu1 %v2733_v22 }
 0x116   :  { %3112 = vmatprep.mubr.f32.mxu1 %v2736_v23  ;;  %v3488_v23 = vpack.c.bf16 %v1074_v20, %v1073_v19  ;;  %v2814_v19 = vld [vmem:[%s4248_s1 + $0xa8] sm:$0xff]  }
 0x117   :  { %v2792_v20 = vunpack.c.l.bf16 %v2814_v19 }
 0x119   :  { %3113 = vmatmul.mubr.f32.gmra.mrb[10].mxu1 %v2737_v25 }
 0x11a   :  { %3115 = vmatprep.mubr.f32.mxu1 %v2740_v26  ;;  %v1176_v26 = vld [vmem:[%s4249_s2 + $0x80] sm:$0xff] }
 0x11b   :  { %v3492_v30 = vpack.c.bf16 %v1177_v27, %v1176_v26  ;;  %v1965_v27 = vld [vmem:[%s4249_s2 + $0x148] sm:$0xff] }
 0x11d   :  { %3116 = vmatmul.mubr.f32.gmra.mrb[12].mxu1 %v2741_v28 }
 0x11e   :  { %3118 = vmatprep.mubr.f32.mxu1 %v2744_v29 }
 0x121   :  { %3119 = vmatmul.mubr.f32.gmra.mrb[14].mxu1 %v2745_v31 }
 0x122   :  { %3121 = vmatprep.mubr.f32.mxu1 %v2748_v32 }
 0x125   :  { %3122 = vmatmul.mubr.f32.gmra.mrb[16].mxu1 %v2749_v34  ;;  %v1280_v34 = vld [vmem:[%s4249_s2 + $0x98] sm:$0xff] }
 0x126   :  { %3124 = vmatprep.mubr.f32.mxu1 %v2752_v35 }
 0x129   :  { %3125 = vmatmul.mubr.f32.gmra.mrb[18].mxu1 %v2753_v37  ;;  %v3496_v37 = vpack.c.bf16 %v1280_v34, %v1279_v33 }
 0x12a   :  { %3127 = vmatprep.mubr.f32.mxu1 %v2756_v38 }
 0x12d   :  { %3128 = vmatmul.mubr.f32.gmra.mrb[20].mxu1 %v2757_v40  ;;  %v1382_v40 = vld [vmem:[%s4249_s2 + $0xa0] sm:$0xff] }
 0x12e   :  { %3130 = vmatprep.mubr.f32.mxu1 %v2760_v41  ;;  %v1383_v41 = vld [vmem:[%s4249_s2 + $0xa8] sm:$0xff] }
 0x131   :  { %3131 = vmatmul.mubr.f32.gmra.mrb[22].mxu1 %v2761_v43 }
 0x132   :  { %3133 = vmatprep.mubr.f32.mxu1 %v2764_v44  ;;  %v3500_v44 = vpack.c.bf16 %v1383_v41, %v1382_v40  ;;  %v1807_v40 = vld [vmem:[%s4249_s2 + $0xf8] sm:$0xff]  ;;  %v1808_v41 = vld [vmem:[%s4249_s2 + $0x100] sm:$0xff] }
 0x135   :  { %3134 = vmatmul.mubr.f32.gmra.mrb[24].mxu1 %v2765_v46 }
 0x136   :  { %3136 = vmatprep.mubr.f32.mxu1 %v2768_v47 }
 0x139   :  { %3137 = vmatmul.mubr.f32.gmra.mrb[26].mxu1 %v2769_v49 }
 0x13a   :  { %3139 = vmatprep.mubr.f32.mxu1 %v2772_v50 }
 0x13d   :  { %3140 = vmatmul.mubr.f32.gmra.mrb[28].mxu1 %v2773_v52  ;;  %v3680_v52 = vmov 0.0  }
 0x13e   :  { %3142 = vmatprep.mubr.f32.mxu1 %v2776_v53  ;;  %v1657_v53 = vld [vmem:[%s4249_s2 + $0xd8] sm:$0xff] }
 0x141   :  { %3143 = vmatmul.mubr.f32.gmra.mrb[30].mxu1 %v2777_v54  ;;  %v1658_v54 = vld [vmem:[%s4249_s2 + $0xe0] sm:$0xff] }
 0x142   :  { %3243 = vmatprep.mubr.msk.f32.mxu1 %vm3679_vm2, %v3680_v52  ;;  %v3511_v56 = vpack.c.bf16 %v1658_v54, %v1657_v53 }
 0x1d8   :  { %v3099_v60 = vpop.f32.mrb[0].mxu1  ;;  %v3093_v61 = vpop.f32.mrb[16].mxu0 }
 0x1d9   :  { %v406_v62 = vpop.f32.mrb[1].mxu1  ;;  %v386_v63 = vpop.f32.mrb[17].mxu0 }
 0x1da   :  { %3149 = vmatprep.mubr.msk.f32.mxu0 %vm569_vm1, %v406_v62 }
 0x1db   :  { %3150 = vmatmul.mubr.msk.f32.vlgmr.msra.gmra.mrb[20].mxu0 %vm569_vm1, %v3099_v60 }
 0x1dc   :  { %v3102_v1 = vpop.f32.mrb[2].mxu1  ;;  %3475 = vmatpush3.bf16.msra.mxu0 %v3472_v57  ;;  %v3096_v2 = vpop.f32.mrb[18].mxu0  ;;  %v1660_v57 = vld [vmem:[%s4249_s2 + $0xf0] sm:$0xff] }
 0x1dd   :  { %v416_v3 = vpop.f32.mrb[3].mxu1  ;;  %v396_v4 = vpop.f32.mrb[19].mxu0  ;;  %3477 = vmatprep.subr.bf16.mxu0 %v3476_v0  ;;  %v3514_v58 = vpack.c.bf16 %v1660_v57, %v1659_v55  ;;  %v1885_v55 = vld [vmem:[%s4249_s2 + $0x118] sm:$0xff] }
 0x1de   :  { %3152 = vmatprep.mubr.msk.f32.mxu0 %vm569_vm1, %v416_v3 }
 0x1df   :  { %3153 = vmatmul.mubr.msk.f32.gmra.mrb[22].mxu0 %vm569_vm1, %v3102_v1 }
 0x1e0   :  { %3159 = vmatprep.mubr.msk.f32.mxu0 %vm569_vm1, %v386_v63  ;;  %v3105_v7 = vpop.f32.mrb[4].mxu1 }
 0x1e1   :  { %v426_v8 = vpop.f32.mrb[5].mxu1 }
 0x1e3   :  { %3160 = vmatmul.mubr.msk.f32.vlgmr.msra.gmra.mrb[20].mxu0 %vm569_vm1, %v3093_v61 }
 0x1e4   :  { %3162 = vmatprep.mubr.msk.f32.mxu0 %vm569_vm1, %v396_v4  ;;  %3479 = vmatpush3.bf16.msra.mxu0 %v3476_v0  ;;  %v3108_v10 = vpop.f32.mrb[6].mxu1 }
 0x1e5   :  { %v436_v11 = vpop.f32.mrb[7].mxu1  ;;  %3481 = vmatprep.subr.bf16.mxu0 %v3480_v9 }
 0x1e7   :  { %3163 = vmatmul.mubr.msk.f32.gmra.mrb[22].mxu0 %vm569_vm1, %v3096_v2 }
 0x1e8   :  { %3169 = vmatprep.mubr.msk.f32.mxu0 %vm569_vm1, %v426_v8  ;;  %v3111_v14 = vpop.f32.mrb[8].mxu1 }
 0x1e9   :  { %v446_v15 = vpop.f32.mrb[9].mxu1 }
 0x1eb   :  { %3170 = vmatmul.mubr.msk.f32.vlgmr.msra.gmra.mrb[20].mxu0 %vm569_vm1, %v3105_v7 }
 0x1ec   :  { %3172 = vmatprep.mubr.msk.f32.mxu0 %vm569_vm1, %v436_v11  ;;  %3483 = vmatpush3.bf16.msra.mxu0 %v3480_v9  ;;  %v3114_v17 = vpop.f32.mrb[10].mxu1  ;;  %v2811_v9 = vld [vmem:[%s4248_s1 + $0x90] sm:$0xff]  }
 0x1ed   :  { %v456_v18 = vpop.f32.mrb[11].mxu1  ;;  %3485 = vmatprep.subr.bf16.mxu0 %v3484_v16  ;;  %v2780_v11 = vunpack.c.l.bf16 %v2811_v9  ;;  %v2781_v12 = vunpack.c.h.bf16 %v2811_v9 }
 0x1ef   :  { %3173 = vmatmul.mubr.msk.f32.gmra.mrb[22].mxu0 %vm569_vm1, %v3108_v10 }
 0x1f0   :  { %3179 = vmatprep.mubr.msk.f32.mxu0 %vm569_vm1, %v446_v15  ;;  %v3117_v21 = vpop.f32.mrb[12].mxu1  ;;  %v2785_v15 = vunpack.c.h.bf16 %v2812_v13 }
 0x1f1   :  { %v466_v22 = vpop.f32.mrb[13].mxu1 }
 0x1f3   :  { %3180 = vmatmul.mubr.msk.f32.vlgmr.msra.gmra.mrb[20].mxu0 %vm569_vm1, %v3111_v14  ;;  %v2784_v14 = vunpack.c.l.bf16 %v2812_v13 }
 0x1f4   :  { %3182 = vmatprep.mubr.msk.f32.mxu0 %vm569_vm1, %v456_v18  ;;  %3487 = vmatpush3.bf16.msra.mxu0 %v3484_v16  ;;  %v3120_v24 = vpop.f32.mrb[14].mxu1  ;;  %v2813_v16 = vld [vmem:[%s4248_s1 + $0xa0] sm:$0xff]  }
 0x1f5   :  { %v476_v25 = vpop.f32.mrb[15].mxu1  ;;  %3489 = vmatprep.subr.bf16.mxu0 %v3488_v23  ;;  %v2789_v18 = vunpack.c.h.bf16 %v2813_v16 }
 0x1f7   :  { %3183 = vmatmul.mubr.msk.f32.gmra.mrb[22].mxu0 %vm569_vm1, %v3114_v17  ;;  %v2788_v17 = vunpack.c.l.bf16 %v2813_v16 }
 0x1f8   :  { %3189 = vmatprep.mubr.msk.f32.mxu0 %vm569_vm1, %v466_v22  ;;  %v3123_v28 = vpop.f32.mrb[16].mxu1  ;;  %v1506_v22 = vld [vmem:[%s4248_s1 + $0xb0] sm:$0xf]  ;;  %s3681_s1 = smov [#allocation2]  }
 0x1f9   :  { %v486_v29 = vpop.f32.mrb[17].mxu1  ;;  %s2623_s17 = sshll.u32 %s3681_s1, 4  ;;  %s2624_s17 = int_to_ptr.vmem [resolvable:$true] %s2623_s17 }
 0x1fa   :  { %s3654_s18 = scalar_lea.vmem %s2624_s17, 32  ;;  %p3659_p1 = scmp.lt.s32.totalorder %s2624_s17, %s2624_s17 }
 0x1fb   :  { %3190 = vmatmul.mubr.msk.f32.vlgmr.msra.gmra.mrb[20].mxu0 %vm569_vm1, %v3117_v21  ;;  %v2793_v21 = vunpack.c.h.bf16 %v2814_v19  ;;  %p3655_p0 = scmp.ne.s32.totalorder %s2624_s17, %s3654_s18  ;;  %p3660_p2 = scmp.lt.s32.totalorder %s3654_s18, %s3654_s18 }
 0x1fc   :  { %3192 = vmatprep.mubr.msk.f32.mxu0 %vm569_vm1, %v476_v25  ;;  %3491 = vmatpush3.bf16.msra.mxu0 %v3488_v23  ;;  %v3126_v31 = vpop.f32.mrb[18].mxu1  ;;  %v1515_v23 = vunpack.c.l.bf16 %v1506_v22  ;;  %v1964_v25 = vld [vmem:[%s4249_s2 + $0x140] sm:$0xff] }
 0x1fd   :  { %v496_v32 = vpop.f32.mrb[19].mxu1  ;;  %3493 = vmatprep.subr.bf16.mxu0 %v3492_v30  ;;  %p3661_p3 = por %p3660_p2, %p3659_p1 }
 0x1ff   :  { %3193 = vmatmul.mubr.msk.f32.gmra.mrb[22].mxu0 %vm569_vm1, %v3120_v24  ;;  %v1963_v24 = vld [vmem:[%s4249_s2 + $0x138] sm:$0xff]  ;;  %p3662_p4 = pnand %p3661_p3, %p3655_p0 }
 0x200   :  { %3199 = vmatprep.mubr.msk.f32.mxu0 %vm569_vm1, %v486_v29  ;;  %v3129_v35 = vpop.f32.mrb[20].mxu1  ;;  %v3535_v26 = vpack.c.bf16 %v1964_v25, %v1963_v24  ;;  %v2199_v25 = vld [vmem:[%s4249_s2 + $0x1a8] sm:$0xff] }
 0x201   :  { %v506_v36 = vpop.f32.mrb[21].mxu1 }
 0x203   :  { %3200 = vmatmul.mubr.msk.f32.vlgmr.msra.gmra.mrb[20].mxu0 %vm569_vm1, %v3123_v28  ;;  %v1966_v28 = vld [vmem:[%s4249_s2 + $0x150] sm:$0xff] }
 0x204   :  { %3202 = vmatprep.mubr.msk.f32.mxu0 %vm569_vm1, %v496_v32  ;;  %3495 = vmatpush3.bf16.msra.mxu0 %v3492_v30  ;;  %v3132_v38 = vpop.f32.mrb[22].mxu1  ;;  %v3538_v29 = vpack.c.bf16 %v1966_v28, %v1965_v27  ;;  %v1653_v30 = vld [vmem:[%s4249_s2 + $0xb8] sm:$0xff] }
 0x205   :  { %v516_v39 = vpop.f32.mrb[23].mxu1  ;;  %3497 = vmatprep.subr.bf16.mxu0 %v3496_v37 }
 0x207   :  { %3203 = vmatmul.mubr.msk.f32.gmra.mrb[22].mxu0 %vm569_vm1, %v3126_v31  ;;  %v1654_v31 = vld [vmem:[%s4249_s2 + $0xc0] sm:$0xff] }
 0x208   :  { %3209 = vmatprep.mubr.msk.f32.mxu0 %vm569_vm1, %v506_v36  ;;  %v3135_v42 = vpop.f32.mrb[24].mxu1  ;;  %v3517_v34 = vpack.c.bf16 %v1654_v31, %v1653_v30  ;;  %v1656_v36 = vld [vmem:[%s4249_s2 + $0xd0] sm:$0xff] }
 0x209   :  { %v526_v43 = vpop.f32.mrb[25].mxu1 }
 0x20b   :  { %3210 = vmatmul.mubr.msk.f32.vlgmr.msra.gmra.mrb[20].mxu0 %vm569_vm1, %v3129_v35  ;;  %v1655_v35 = vld [vmem:[%s4249_s2 + $0xc8] sm:$0xff] }
 0x20c   :  { %3212 = vmatprep.mubr.msk.f32.mxu0 %vm569_vm1, %v516_v39  ;;  %3499 = vmatpush3.bf16.msra.mxu0 %v3496_v37  ;;  %v3138_v45 = vpop.f32.mrb[26].mxu1  ;;  %v3520_v39 = vpack.c.bf16 %v1656_v36, %v1655_v35 }
 0x20d   :  { %v536_v46 = vpop.f32.mrb[27].mxu1  ;;  %3501 = vmatprep.subr.bf16.mxu0 %v3500_v44 }
 0x20f   :  { %3213 = vmatmul.mubr.msk.f32.gmra.mrb[22].mxu0 %vm569_vm1, %v3132_v38 }
 0x210   :  { %3219 = vmatprep.mubr.msk.f32.mxu0 %vm569_vm1, %v526_v43  ;;  %v3141_v47 = vpop.f32.mrb[28].mxu1 }
 0x211   :  { %v546_v48 = vpop.f32.mrb[29].mxu1 }
 0x213   :  { %3220 = vmatmul.mubr.msk.f32.vlgmr.msra.gmra.mrb[20].mxu0 %vm569_vm1, %v3135_v42 }
 0x214   :  { %3222 = vmatprep.mubr.msk.f32.mxu0 %vm569_vm1, %v536_v46  ;;  %3503 = vmatpush3.bf16.msra.mxu0 %v3500_v44  ;;  %v3144_v49 = vpop.f32.mrb[30].mxu1  ;;  %v3523_v44 = vpack.c.bf16 %v1808_v41, %v1807_v40  ;;  %v1810_v46 = vld [vmem:[%s4249_s2 + $0x110] sm:$0xff] }
 0x215   :  { %v556_v50 = vpop.f32.mrb[31].mxu1  ;;  %3510 = vmatprep.subr.bf16.mxu0 %v3678_v51 }
 0x217   :  { %3223 = vmatmul.mubr.msk.f32.gmra.mrb[22].mxu0 %vm569_vm1, %v3138_v45  ;;  %v1809_v45 = vld [vmem:[%s4249_s2 + $0x108] sm:$0xff] }
 0x218   :  { %3229 = vmatprep.mubr.msk.f32.mxu0 %vm569_vm1, %v546_v48  ;;  %v2120_v48 = vld [vmem:[%s4249_s2 + $0x180] sm:$0xff]  ;;  %v3526_v53 = vpack.c.bf16 %v1810_v46, %v1809_v45 }
 0x21b   :  { %3230 = vmatmul.mubr.msk.f32.vlgmr.msra.gmra.mrb[20].mxu0 %vm569_vm1, %v3141_v47  ;;  %v2119_v47 = vld [vmem:[%s4249_s2 + $0x178] sm:$0xff] }
 0x21c   :  { %3232 = vmatprep.mubr.msk.f32.mxu0 %vm569_vm1, %v556_v50  ;;  %3512 = vmatpush3.bf16.msra.mxu0 %v3511_v56  ;;  %v3547_v54 = vpack.c.bf16 %v2120_v48, %v2119_v47  ;;  %v1886_v56 = vld [vmem:[%s4249_s2 + $0x120] sm:$0xff] }
 0x21d   :  { %3513 = vmatprep.subr.bf16.mxu0 %v3678_v51 }
 0x21f   :  { %3233 = vmatmul.mubr.msk.f32.gmra.mrb[22].mxu0 %vm569_vm1, %v3144_v49 }
 0x220   :  { %3278 = vmatprep.mubr.msk.f32.mxu0 %vm3679_vm2, %v3680_v52  ;;  %3515 = vmatpush3.bf16.msra.mxu0 %v3514_v58  ;;  %v2121_v58 = vld [vmem:[%s4249_s2 + $0x188] sm:$0xff] }
 0x221   :  { %3516 = vmatprep.subr.bf16.mxu0 %v3678_v51 }
 0x2ee   :  { %v3231_v60 = vpop.f32.mrb[20].mxu0 }
 0x2ef   :  { %v1491_v61 = vadd.f32 %v3231_v60, %v2683_v59  ;;  %v1462_v62 = vpop.f32.mrb[21].mxu0 }
 0x2f0   :  { %v1490_v63 = vadd.f32 %v2683_v59, %v1462_v62  ;;  %v1887_v62 = vld [vmem:[%s4249_s2 + $0x128] sm:$0xff] }
 0x2f1   :  { %v1495_v0 = vmax.f32 %v1491_v61, 0.0  ;;  %v3529_v61 = vpack.c.bf16 %v1886_v56, %v1885_v55  ;;  %v2702_v55 = vld [vmem:[%s4249_s2 + $0x1d8] ss:$0 sm:$0xff] }
 0x2f2   :  { %v1494_v1 = vmax.f32 %v1490_v63, 0.0  ;;  %v3234_v2 = vpop.f32.mrb[22].mxu0  ;;  %v1888_v63 = vld [vmem:[%s4249_s2 + $0x130] sm:$0xff] }
 0x2f3   :  { %v1493_v3 = vadd.f32 %v3234_v2, %v2683_v59  ;;  %v1472_v4 = vpop.f32.mrb[23].mxu0  ;;  %v2275_v2 = vld [vmem:[%s4249_s2 + $0x1b8] sm:$0xff] }
 0x2f4   :  { %v3505_v5 = vpack.c.bf16 %v1495_v0, %v1494_v1  ;;  %v1492_v6 = vadd.f32 %v2683_v59, %v1472_v4  ;;  %v2122_v59 = vld [vmem:[%s4249_s2 + $0x190] sm:$0xff] }
 0x2f5   :  { %v1497_v7 = vmax.f32 %v1493_v3, 0.0  ;;  %v3550_v0 = vpack.c.bf16 %v2122_v59, %v2121_v58  ;;  %v2276_v3 = vld [vmem:[%s4249_s2 + $0x1c0] sm:$0xff]  ;;  %v2436_v58 = vld [vmem:[%s4250_s3 + $0x8] sm:$0xff] }
 0x2f6   :  { %v1496_v8 = vmax.f32 %v1492_v6, 0.0  ;;  %3506 = vmatpush3.bf16.msra.mxu1 %v3505_v5  ;;  %v3532_v5 = vpack.c.bf16 %v1888_v63, %v1887_v62  ;;  %v2041_v6 = vld [vmem:[%s4249_s2 + $0x158] sm:$0xff]  ;;  %v2437_v63 = vld [vmem:[%s4250_s3 + $0x10] sm:$0xff] }
 0x2f7   :  { %3507 = vmatprep.subr.bf16.mxu1 %v3678_v51 }
 0x2f8   :  { %v3508_v10 = vpack.c.bf16 %v1497_v7, %v1496_v8  ;;  %v2042_v7 = vld [vmem:[%s4249_s2 + $0x160] sm:$0xff]  ;;  %v3559_v8 = vpack.c.bf16 %v2276_v3, %v2275_v2  ;;  %v2440_v3 = vld [vmem:[%s4250_s3 + $0x28] sm:$0xff] }
 0x2f9   :  { %v3541_v13 = vpack.c.bf16 %v2042_v7, %v2041_v6  ;;  %v2439_v2 = vld [vmem:[%s4250_s3 + $0x20] sm:$0xff] }
 0x2fa   :  { %3509 = vmatpush3.bf16.msra.mxu1 %v3508_v10  ;;  %v2277_v10 = vld [vmem:[%s4249_s2 + $0x1c8] sm:$0xff] }
 0x2fb   :  { %3534 = vmatprep.subr.bf16.mxu1 %v3678_v51 }
 0x2fd   :  { %3244 = vmatmul.mubr.msk.f32.vlgmr.msra.gmra.mrb[32].mxu1 %vm38_vm0, %v2780_v11  ;;  %v2278_v11 = vld [vmem:[%s4249_s2 + $0x1d0] sm:$0xff] }
 0x2fe   :  { %3246 = vmatprep.mubr.msk.f32.mxu1 %vm3679_vm2, %v3680_v52  ;;  %3536 = vmatpush3.bf16.msra.mxu1 %v3535_v26  ;;  %v3562_v16 = vpack.c.bf16 %v2278_v11, %v2277_v10  ;;  %v2200_v26 = vld [vmem:[%s4249_s2 + $0x1b0] sm:$0xff]  ;;  %v2532_v11 = vld [vmem:[%s4250_s3 + $0x58] sm:$0xff] }
 0x2ff   :  { %3537 = vmatprep.subr.bf16.mxu1 %v3678_v51  ;;  %v3556_v27 = vpack.c.bf16 %v2200_v26, %v2199_v25  ;;  %v2531_v10 = vld [vmem:[%s4250_s3 + $0x50] sm:$0xff] }
 0x301   :  { %3247 = vmatmul.mubr.msk.f32.gmra.mrb[34].mxu1 %vm38_vm0, %v2781_v12 }
 0x302   :  { %3249 = vmatprep.mubr.msk.f32.mxu1 %vm3679_vm2, %v3680_v52  ;;  %3539 = vmatpush3.bf16.msra.mxu1 %v3538_v29 }
 0x303   :  { %3546 = vmatprep.subr.bf16.mxu1 %v3678_v51 }
 0x305   :  { %3250 = vmatmul.mubr.msk.f32.gmra.mrb[36].mxu1 %vm38_vm0, %v2784_v14  ;;  %v2043_v14 = vld [vmem:[%s4249_s2 + $0x168] sm:$0xff] }
 0x306   :  { %3252 = vmatprep.mubr.msk.f32.mxu1 %vm3679_vm2, %v3680_v52 }
 0x309   :  { %3253 = vmatmul.mubr.msk.f32.gmra.mrb[38].mxu1 %vm38_vm0, %v2785_v15  ;;  %v2044_v15 = vld [vmem:[%s4249_s2 + $0x170] sm:$0xff] }
 0x30a   :  { %3255 = vmatprep.mubr.msk.f32.mxu1 %vm3679_vm2, %v3680_v52  ;;  %v3544_v19 = vpack.c.bf16 %v2044_v15, %v2043_v14  ;;  %v2534_v15 = vld [vmem:[%s4250_s3 + $0x68] sm:$0xff] }
 0x30d   :  { %3256 = vmatmul.mubr.msk.f32.gmra.mrb[40].mxu1 %vm38_vm0, %v2788_v17 }
 0x30e   :  { %3258 = vmatprep.mubr.msk.f32.mxu1 %vm3679_vm2, %v3680_v52 }
 0x311   :  { %3259 = vmatmul.mubr.msk.f32.gmra.mrb[42].mxu1 %vm38_vm0, %v2789_v18 }
 0x312   :  { %3261 = vmatprep.mubr.msk.f32.mxu1 %vm3679_vm2, %v3680_v52 }
 0x315   :  { %3262 = vmatmul.mubr.msk.f32.gmra.mrb[44].mxu1 %vm38_vm0, %v2792_v20  ;;  %v2197_v20 = vld [vmem:[%s4249_s2 + $0x198] sm:$0xff] }
 0x316   :  { %3264 = vmatprep.mubr.msk.f32.mxu1 %vm3679_vm2, %v3680_v52 }
 0x319   :  { %3265 = vmatmul.mubr.msk.f32.gmra.mrb[46].mxu1 %vm38_vm0, %v2793_v21  ;;  %v2198_v21 = vld [vmem:[%s4249_s2 + $0x1a0] sm:$0xff] }
 0x31a   :  { %3267 = vmatprep.mubr.msk.f32.mxu1 %vm3679_vm2, %v3680_v52  ;;  %v3553_v24 = vpack.c.bf16 %v2198_v21, %v2197_v20  ;;  %v2704_v21 = vld [vmem:[%s4250_s3 + $0x40] ss:$0 sm:$0xff] }
 0x31d   :  { %3268 = vmatmul.mubr.msk.f32.gmra.mrb[48].mxu1 %vm38_vm0, %v1515_v23 }
 0x31e   :  { %3322 = vmatprep.mubr.msk.f32.mxu1 %vm3679_vm2, %v3680_v52 }
 0x3d0   :  { %v1609_v32 = vpop.f32.mrb[32].mxu1 }
 0x3d1   :  { %v3245_v33 = vpop.f32.mrb[33].mxu1 }
 0x3d4   :  { %v1614_v37 = vpop.f32.mrb[34].mxu1 }
 0x3d5   :  { %3279 = vmatmul.mubr.msk.f32.vlgmr.msra.gmra.mrb[24].mxu0 %vm38_vm0, %v1614_v37  ;;  %v3248_v38 = vpop.f32.mrb[35].mxu1 }
 0x3d6   :  { %3518 = vmatpush3.bf16.msra.mxu0 %v3517_v34  ;;  %3289 = vmatprep.mubr.msk.f32.mxu0 %vm3679_vm2, %v3680_v52 }
 0x3d7   :  { %3519 = vmatprep.subr.bf16.mxu0 %v3678_v51 }
 0x3d8   :  { %v1619_v42 = vpop.f32.mrb[36].mxu1 }
 0x3d9   :  { %v3251_v43 = vpop.f32.mrb[37].mxu1 }
 0x3da   :  { %3521 = vmatpush3.bf16.msra.mxu0 %v3520_v39 }
 0x3db   :  { %3522 = vmatprep.subr.bf16.mxu0 %v3678_v51 }
 0x3dc   :  { %v1624_v49 = vpop.f32.mrb[38].mxu1 }
 0x3dd   :  { %3290 = vmatmul.mubr.msk.f32.vlgmr.msra.gmra.mrb[26].mxu0 %vm38_vm0, %v1609_v32  ;;  %v3254_v50 = vpop.f32.mrb[39].mxu1 }
 0x3de   :  { %3524 = vmatpush3.bf16.msra.mxu0 %v3523_v44  ;;  %3300 = vmatprep.mubr.msk.f32.mxu0 %vm3679_vm2, %v3680_v52 }
 0x3df   :  { %3525 = vmatprep.subr.bf16.mxu0 %v3678_v51 }
 0x3e0   :  { %v1629_v57 = vpop.f32.mrb[40].mxu1 }
 0x3e1   :  { %3323 = vmatmul.mubr.msk.f32.vlgmr.msra.gmra.mrb[50].mxu1 %vm38_vm0, %v1629_v57  ;;  %v3257_v60 = vpop.f32.mrb[41].mxu1  ;;  %v2435_v57 = vld [vmem:[%s4250_s3] sm:$0xff] }
 0x3e2   :  { %3527 = vmatpush3.bf16.msra.mxu0 %v3526_v53  ;;  %3548 = vmatpush3.bf16.msra.mxu1 %v3547_v54  ;;  %v3565_v62 = vpack.c.bf16 %v2436_v58, %v2435_v57 }
 0x3e3   :  { %3528 = vmatprep.subr.bf16.mxu0 %v3678_v51  ;;  %3549 = vmatprep.subr.bf16.mxu1 %v3678_v51 }
 0x3e4   :  { %v1634_v1 = vpop.f32.mrb[42].mxu1  ;;  %3344 = vmatprep.mubr.msk.f32.mxu1 %vm3679_vm2, %v3680_v52 }
 0x3e5   :  { %3301 = vmatmul.mubr.msk.f32.vlgmr.msra.gmra.mrb[28].mxu0 %vm38_vm0, %v1619_v42  ;;  %v3260_v4 = vpop.f32.mrb[43].mxu1 }
 0x3e6   :  { %3530 = vmatpush3.bf16.msra.mxu0 %v3529_v61  ;;  %3311 = vmatprep.mubr.msk.f32.mxu0 %vm3679_vm2, %v3680_v52  ;;  %v2360_v61 = vld [vmem:[%s4249_s2 + $0x1e0] sm:$0x3]  ;;  %v3571_v4 = vpack.c.bf16 %v2440_v3, %v2439_v2 }
 0x3e7   :  { %3531 = vmatprep.subr.bf16.mxu0 %v3678_v51  ;;  %3551 = vmatpush3.bf16.msra.mxu1 %v3550_v0  ;;  %v2438_v0 = vld [vmem:[%s4250_s3 + $0x18] sm:$0xff] }
 0x3e8   :  { %v1639_v9 = vpop.f32.mrb[44].mxu1  ;;  %3558 = vmatprep.subr.bf16.mxu1 %v3678_v51 }
 0x3e9   :  { %v3263_v12 = vpop.f32.mrb[45].mxu1 }
 0x3ea   :  { %3533 = vmatpush3.bf16.msra.mxu0 %v3532_v5  ;;  %3345 = vmatmul.mubr.msk.f32.vlgmr.msra.gmra.mrb[52].mxu1 %vm38_vm0, %v1639_v9  ;;  %v2441_v5 = vld [vmem:[%s4250_s3 + $0x30] sm:$0xff]  ;;  %v2530_v9 = vld [vmem:[%s4250_s3 + $0x48] sm:$0xff] }
 0x3eb   :  { %3540 = vmatprep.subr.bf16.mxu0 %v3678_v51  ;;  %3560 = vmatpush3.bf16.msra.mxu1 %v3559_v8  ;;  %v3577_v12 = vpack.c.bf16 %v2531_v10, %v2530_v9 }
 0x3ec   :  { %3561 = vmatprep.subr.bf16.mxu1 %v3678_v51  ;;  %v1644_v17 = vpop.f32.mrb[46].mxu1  ;;  %3366 = vmatprep.mubr.msk.f32.mxu1 %vm3679_vm2, %v3680_v52 }
 0x3ed   :  { %3312 = vmatmul.mubr.msk.f32.vlgmr.msra.gmra.mrb[30].mxu0 %vm38_vm0, %v1624_v49  ;;  %v3266_v18 = vpop.f32.mrb[47].mxu1 }
 0x3ee   :  { %3542 = vmatpush3.bf16.msra.mxu0 %v3541_v13  ;;  %3333 = vmatprep.mubr.msk.f32.mxu0 %vm3679_vm2, %v3680_v52  ;;  %v2533_v13 = vld [vmem:[%s4250_s3 + $0x60] sm:$0xff]  ;;  %v2536_v18 = vld [vmem:[%s4250_s3 + $0x78] sm:$0xff] }
 0x3ef   :  { %3543 = vmatprep.subr.bf16.mxu0 %v3678_v51  ;;  %3563 = vmatpush3.bf16.msra.mxu1 %v3562_v16  ;;  %v3580_v14 = vpack.c.bf16 %v2533_v13, %v2532_v11  ;;  %v2535_v16 = vld [vmem:[%s4250_s3 + $0x70] sm:$0xff] }
 0x3f0   :  { %v1649_v22 = vpop.f32.mrb[48].mxu1  ;;  %3576 = vmatprep.subr.bf16.mxu1 %v3678_v51 }
 0x3f1   :  { %v3269_v23 = vpop.f32.mrb[49].mxu1 }
 0x3f2   :  { %3545 = vmatpush3.bf16.msra.mxu0 %v3544_v19  ;;  %3367 = vmatmul.mubr.msk.f32.vlgmr.msra.gmra.mrb[54].mxu1 %vm38_vm0, %v1649_v22  ;;  %v2537_v19 = vld [vmem:[%s4250_s3 + $0x80] sm:$0xff] }
 0x3f3   :  { %3552 = vmatprep.subr.bf16.mxu0 %v3678_v51  ;;  %3425 = vmatprep.mubr.msk.f32.mxu1 %vm3679_vm2, %v3680_v52  ;;  %v3586_v20 = vpack.c.bf16 %v2537_v19, %v2536_v18 }
 0x3f4   :  { %3578 = vmatpush3.bf16.msra.mxu1 %v3577_v12 }
 0x3f5   :  { %3334 = vmatmul.mubr.msk.f32.vlgmr.msra.gmra.mrb[32].mxu0 %vm38_vm0, %v1634_v1  ;;  %v3568_v1 = vpack.c.bf16 %v2438_v0, %v2437_v63  ;;  %3579 = vmatprep.subr.bf16.mxu1 %v3678_v51 }
 0x3f6   :  { %3554 = vmatpush3.bf16.msra.mxu0 %v3553_v24  ;;  %3355 = vmatprep.mubr.msk.f32.mxu0 %vm3679_vm2, %v3680_v52 }
 0x3f7   :  { %3555 = vmatprep.subr.bf16.mxu0 %v3678_v51 }
 0x3f8   :  { %3581 = vmatpush3.bf16.msra.mxu1 %v3580_v14 }
 0x3f9   :  { %3582 = vmatprep.subr.bf16.mxu1 %v3678_v51 }
 0x3fa   :  { %3557 = vmatpush3.bf16.msra.mxu0 %v3556_v27  ;;  %v2538_v27 = vld [vmem:[%s4250_s3 + $0x88] sm:$0xff] }
 0x3fb   :  { %3369 = vmatprep.subr.mxu0 %v3680_v52 }
 0x3fd   :  { %3356 = vmatmul.mubr.msk.f32.vlgmr.msra.gmra.mrb[34].mxu0 %vm38_vm0, %v1644_v17  ;;  %v3583_v17 = vpack.c.bf16 %v2535_v16, %v2534_v15 }
 0x3fe   :  { %3371 = vmatprep.mubr.msk.f32.mxu0 %vm3679_vm2, %v3680_v52 }
 0x3ff   :  { %3584 = vmatpush3.bf16.msra.mxu1 %v3583_v17 }
 0x400   :  { %3585 = vmatprep.subr.bf16.mxu1 %v3678_v51 }
 0x403   :  { %3587 = vmatpush3.bf16.msra.mxu1 %v3586_v20 }
 0x404   :  { %3588 = vmatprep.subr.bf16.mxu1 %v3678_v51 }
 0x4a8   :  { %v1730_v28 = vpop.f32.mrb[24].mxu0 }
 0x4a9   :  { %v3280_v29 = vpop.f32.mrb[25].mxu0 }
 0x4b0   :  { %v1803_v30 = vpop.f32.mrb[26].mxu0 }
 0x4b1   :  { %v1804_v31 = vadd.f32 %v1803_v30, %v1730_v28  ;;  %v3291_v32 = vpop.f32.mrb[27].mxu0  ;;  %v2539_v28 = vld [vmem:[%s4250_s3 + $0x90] sm:$0xff]  ;;  %v2540_v30 = vld [vmem:[%s4250_s3 + $0x98] sm:$0xff] }
 0x4b2   :  { %v3589_v29 = vpack.c.bf16 %v2539_v28, %v2538_v27 }
 0x4b4   :  { %v2036_v33 = vpop.f32.mrb[50].mxu1  ;;  %3590 = vmatpush3.bf16.msra.mxu1 %v3589_v29 }
 0x4b5   :  { %v3324_v34 = vpop.f32.mrb[51].mxu1  ;;  %3591 = vmatprep.subr.bf16.mxu1 %v3678_v51 }
 0x4b6   :  { %v2543_v34 = vld [vmem:[%s4250_s3 + $0xb0] sm:$0xff] }
 0x4b8   :  { %v1880_v35 = vpop.f32.mrb[28].mxu0 }
 0x4b9   :  { %v1884_v36 = vadd.f32 %v1880_v35, %v1804_v31  ;;  %v3302_v37 = vpop.f32.mrb[29].mxu0  ;;  %v2541_v31 = vld [vmem:[%s4250_s3 + $0xa0] sm:$0xff] }
 0x4ba   :  { %v3592_v32 = vpack.c.bf16 %v2541_v31, %v2540_v30  ;;  %v2545_v37 = vld [vmem:[%s4250_s3 + $0xc0] sm:$0xff] }
 0x4bc   :  { %3593 = vmatpush3.bf16.msra.mxu1 %v3592_v32 }
 0x4bd   :  { %v2192_v38 = vpop.f32.mrb[52].mxu1  ;;  %3594 = vmatprep.subr.bf16.mxu1 %v3678_v51 }
 0x4be   :  { %v3346_v39 = vpop.f32.mrb[53].mxu1 }
 0x4c0   :  { %v1958_v40 = vpop.f32.mrb[30].mxu0 }
 0x4c1   :  { %v1962_v41 = vadd.f32 %v1958_v40, %v1884_v36  ;;  %v3313_v42 = vpop.f32.mrb[31].mxu0  ;;  %v2544_v36 = vld [vmem:[%s4250_s3 + $0xb8] sm:$0xff] }
 0x4c3   :  { %v2040_v43 = vadd.f32 %v2036_v33, %v1962_v41  ;;  %v2542_v33 = vld [vmem:[%s4250_s3 + $0xa8] sm:$0xff] }
 0x4c4   :  { %v3595_v35 = vpack.c.bf16 %v2543_v34, %v2542_v33 }
 0x4c5   :  { %v2348_v44 = vpop.f32.mrb[54].mxu1 }
 0x4c6   :  { %v3368_v45 = vpop.f32.mrb[55].mxu1  ;;  %3596 = vmatpush3.bf16.msra.mxu1 %v3595_v35 }
 0x4c7   :  { %3597 = vmatprep.subr.bf16.mxu1 %v3678_v51 }
 0x4c8   :  { %v2114_v46 = vpop.f32.mrb[32].mxu0 }
 0x4c9   :  { %v2118_v47 = vadd.f32 %v2114_v46, %v2040_v43  ;;  %v3335_v48 = vpop.f32.mrb[33].mxu0 }
 0x4cb   :  { %v2196_v49 = vadd.f32 %v2192_v38, %v2118_v47  ;;  %v3598_v38 = vpack.c.bf16 %v2545_v37, %v2544_v36 }
 0x4cd   :  { %3599 = vmatpush3.bf16.msra.mxu1 %v3598_v38 }
 0x4d0   :  { %v2270_v50 = vpop.f32.mrb[34].mxu0 }
 0x4d1   :  { %v2274_v53 = vadd.f32 %v2270_v50, %v2196_v49  ;;  %v3357_v54 = vpop.f32.mrb[35].mxu0 }
 0x4d3   :  { %v2352_v56 = vadd.f32 %v2348_v44, %v2274_v53 }
 0x4d5   :  { %v2358_v59 = vadd.f32 %v2702_v55, %v2352_v56 }
 0x4d7   :  { %v2359_v60 = vmax.f32 %v2358_v59, 0.0 }
 0x4d9   :  { %3370 = vmatpush3.msra.mxu0 %v2359_v60 }
 0x4da   :  { %3372 = vmatmul.mubr.msk.f32.vlgmr.msra.gmra.mrb[36].mxu0 %vm2361_vm3, %v2360_v61  ;;  %3564 = vmatprep.subr.bf16.mxu0 %v3678_v51 }
 0x4db   :  { %3566 = vmatpush3.bf16.msra.mxu0 %v3565_v62  ;;  %3390 = vmatprep.mubr.msk.f32.mxu0 %vm3679_vm2, %v3680_v52  ;;  %v2442_v52 = vld [vmem:[%s4250_s3 + $0x38] sm:$0xff] }
 0x4dc   :  { %3567 = vmatprep.subr.bf16.mxu0 %v3678_v51  ;;  %v3574_v6 = vpack.c.bf16 %v2442_v52, %v2441_v5 }
 0x4df   :  { %3569 = vmatpush3.bf16.msra.mxu0 %v3568_v1 }
 0x4e0   :  { %3570 = vmatprep.subr.bf16.mxu0 %v3678_v51 }
 0x4e3   :  { %3572 = vmatpush3.bf16.msra.mxu0 %v3571_v4 }
 0x4e4   :  { %3573 = vmatprep.subr.bf16.mxu0 %v3678_v51 }
 0x4e7   :  { %3575 = vmatpush3.bf16.msra.mxu0 %v3574_v6 }
 0x5ad   :  { %v2431_v7 = vpop.f32.mrb[36].mxu0 }
 0x5ae   :  { %3391 = vmatmul.mubr.msk.f32.vlgmr.msra.gmra.mrb[38].mxu0 %vm2448_vm4, %v2431_v7  ;;  %v3373_v8 = vpop.f32.mrb[37].mxu0 }
 0x681   :  { %v2518_v22 = vpop.f32.mrb[38].mxu0 }
 0x682   :  { %v2519_v23 = vadd.f32 %v2704_v21, %v2518_v22  ;;  %v3392_v24 = vpop.f32.mrb[39].mxu0 }
 0x684   :  { %v2522_v25 = vmul.f32 %v2519_v23, %v2519_v23 }
 0x686   :  { %v2524_v26 = vsel %vm2523_vm5, %v2522_v25, 0.0 }
 0x687   :  { %2525 = vadd.xlane.f32.xlu0 %v2524_v26 }
 0x714   :  { %v2526_v39 = vpop.xlane.xlu0 %2525 }
 0x715   :  { %v2527_v40 = vmax.f32 %v2526_v39, 1e-24 }
 0x717   :  { %3652 = vrsqrt.f32 %v2527_v40 }
 0x721   :  { %v3653_v41 = vpop.eup %3652 }
 0x722   :  { %v2529_v42 = vmul.f32 %v3653_v41, %v2519_v23 }
 0x724   :  { %3426 = vmatmul.mubr.f32.vlgmr.msra.gmra.mrb[56].mxu1 %v2529_v42 }
 0x7f7   :  { %v2612_v43 = vpop.f32.mrb[56].mxu1 }
 0x7f8   :  { %2616 = vst [vmem:[#allocation2] sm:$0x3] %v2612_v43  ;;  %v3427_v44 = vpop.f32.mrb[57].mxu1 }
 0x7f9   :  { %3665 = shalt.err (!%p3662_p4)
}
 0x7fa   :  { %s3666_s20 = scalar_lea.hbm %s4251_s4, 32 }
 0x7fb   :  { %p3667_p5 = scmp.ne.s32.totalorder %s4251_s4, %s3666_s20  ;;  %p3670_p6 = scmp.lt.u32.totalorder %s3666_s20, %s4251_s4 }
 0x7fd   :  { %p3672_p7 = pnand %p3670_p6, %p3667_p5 }
 0x7ff   :  { %3675 = shalt.err (!%p3672_p7)
}
 0x800   :  { %2626 = dma.vmem_to_hbm [thread:$0]  %s2624_s17, 32, %s4251_s4, [#allocation3]  }
 0x801   :  { %3676 = dma.done.wait [#allocation3], 32  }
 0x802   :  { %3677 = vsyncadd [#allocation3], 4294967264 }
 0x803   :  { %2630 = vsyncpa [#allocation3], 1 }

</bundles_post_ra>
